<compile_context>
chip_gen: v6e
topology: v6e:2x2x1
jax: 0.10.0
libtpu: 0.0.40
codegen_flags: <defaults>
</compile_context>

<pallas_src>
import functools

import jax
import jax.numpy as jnp
from jax.experimental import pallas as pl
from jax.experimental.pallas import tpu as pltpu


# ----------------------------------------------------------------------------
# Fused Pallas kernel: all LSTM layers + sigmoid head in one invocation.
# ----------------------------------------------------------------------------
def _make_fused_kernel(n_layers, T, BP, H):
    """Builds the kernel for static (n_layers, T, padded batch BP, hidden H)."""

    def kernel(*refs):
        # refs layout:
        #   [x2d, wih_0, whh_0, b_0, ..., wih_{L-1}, whh_{L-1}, b_{L-1},
        #    w_out, b_out, out_ref, (seq_scratch if L > 1)]
        x_ref = refs[0]
        w_out_ref = refs[1 + 3 * n_layers]   # (1, H)
        b_out_ref = refs[2 + 3 * n_layers]   # (1, 1)
        out_ref = refs[3 + 3 * n_layers]     # (BP, 1)
        seq_ref = refs[4 + 3 * n_layers] if n_layers > 1 else None  # (T*BP, H)

        h = None
        for l in range(n_layers):
            wih = refs[1 + 3 * l][...]       # (D_in, 4H)
            whh = refs[2 + 3 * l][...]       # (H,   4H)
            b = refs[3 + 3 * l][...]         # (1,   4H)

            # ---- hoisted input projection: one MXU matmul per layer --------
            # Both layer 0 (x) and layer l>0 (scratch) are time-major 2-D, so
            # the per-step slab below is a contiguous sublane group.
            src = x_ref[...] if l == 0 else seq_ref[...]        # (T*BP, D_in)
            gx = jnp.dot(src, wih,
                         preferred_element_type=jnp.float32) + b  # (T*BP, 4H)

            # ---- recurrence (fully unrolled; only h @ W_hh on the MXU) -----
            h = jnp.zeros((BP, H), jnp.float32)
            c = jnp.zeros((BP, H), jnp.float32)
            last_layer = (l + 1 == n_layers)
            for t in range(T):
                gates = gx[t * BP:(t + 1) * BP, :] + jnp.dot(
                    h, whh, preferred_element_type=jnp.float32)   # (BP, 4H)
                # 2 EUP pushes over the full 128-lane vreg instead of 4 over
                # quarter-width slices.
                sg = jax.nn.sigmoid(gates)
                tg = jnp.tanh(gates)
                i_g = sg[:, 0 * H:1 * H]
                f_g = sg[:, 1 * H:2 * H]
                g_g = tg[:, 2 * H:3 * H]
                o_g = sg[:, 3 * H:4 * H]
                c = f_g * c + i_g * g_g
                h = o_g * jnp.tanh(c)
                if not last_layer:
                    # Stream the hidden state into the inter-layer scratch.
                    seq_ref[t * BP:(t + 1) * BP, :] = h

        # ---- fused head: sigmoid(<h_last, w_out> + b) -----------------------
        # VPU multiply + XLU lane reduce; avoids a 1-column MXU matmul at the
        # kernel tail where nothing would hide its latency.
        logits = jnp.sum(h * w_out_ref[...], axis=-1, keepdims=True)  # (BP, 1)
        out_ref[...] = jax.nn.sigmoid(logits + b_out_ref[...])

    return kernel


# ----------------------------------------------------------------------------
# Wrapper
# ----------------------------------------------------------------------------
@functools.partial(jax.jit, static_argnames=("n_layers",))
def lstm_discriminator_forward(x, params, n_layers):
    """x: (B, T, input_dim) -> (B, 1), matching the PyTorch forward (eval)."""
    B, T, D = x.shape
    H = params["layers"][0][1].shape[0]          # whh_t is (H, 4H)
    BP = ((B + 7) // 8) * 8                      # pad batch to full sublane group

    x32 = x.astype(jnp.float32)
    if BP != B:
        x32 = jnp.pad(x32, ((0, BP - B), (0, 0), (0, 0)))
    # Time-major 2-D layout: row block [t*BP, (t+1)*BP) holds timestep t.
    x2d = jnp.transpose(x32, (1, 0, 2)).reshape(T * BP, D)

    flat_weights = []
    for l in range(n_layers):
        flat_weights.extend(params["layers"][l])  # wih_t, whh_t, b

    scratch_shapes = []
    if n_layers > 1:
        # Inter-layer hidden-sequence slab (time-major), written per step.
        scratch_shapes.append(pltpu.VMEM((T * BP, H), jnp.float32))

    kernel = _make_fused_kernel(n_layers, T, BP, H)
    out_padded = pl.pallas_call(
        kernel,
        out_shape=jax.ShapeDtypeStruct((BP, 1), jnp.float32),
        scratch_shapes=scratch_shapes,
    )(x2d, *flat_weights, params["w_out"], params["b_out"])

    return out_padded[:B]                         # drop padded batch rows


# ----------------------------------------------------------------------------
# Deterministic parameter construction (mirrors nn.LSTM / nn.Linear shapes)
# ----------------------------------------------------------------------------
def init_params(key, input_dim, hidden, n_layers):
    bound = 1.0 / jnp.sqrt(jnp.float32(hidden))
    layers = []
    for l in range(n_layers):
        d_in = input_dim if l == 0 else hidden
        key, k1, k2, k3, k4 = jax.random.split(key, 5)
        w_ih = jax.random.uniform(k1, (4 * hidden, d_in), jnp.float32, -bound, bound)
        w_hh = jax.random.uniform(k2, (4 * hidden, hidden), jnp.float32, -bound, bound)
        b_ih = jax.random.uniform(k3, (4 * hidden,), jnp.float32, -bound, bound)
        b_hh = jax.random.uniform(k4, (4 * hidden,), jnp.float32, -bound, bound)
        layers.append((w_ih.T, w_hh.T, (b_ih + b_hh).reshape(1, 4 * hidden)))
    key, k5, k6 = jax.random.split(key, 3)
    w_out = jax.random.uniform(k5, (1, hidden), jnp.float32, -bound, bound)  # (1, H) row
    b_out = jax.random.uniform(k6, (1,), jnp.float32, -bound, bound)
    return {"layers": layers, "w_out": w_out, "b_out": b_out.reshape(1, 1)}


# ----------------------------------------------------------------------------
# Pure-JAX reference (correctness checking only)
# ----------------------------------------------------------------------------
def _dot_f32(a, b):
    return jnp.dot(a, b, preferred_element_type=jnp.float32,
                   precision=jax.lax.Precision.HIGHEST)


def reference_forward(x, params, n_layers):
    B, T, _ = x.shape
    inp = x.astype(jnp.float32)
    for l in range(n_layers):
        wih_t, whh_t, b = params["layers"][l]
        H = whh_t.shape[0]
        h = jnp.zeros((B, H), jnp.float32)
        c = jnp.zeros((B, H), jnp.float32)
        hs = []
        for t in range(T):
            gates = _dot_f32(inp[:, t, :], wih_t) + _dot_f32(h, whh_t) + b
            i = jax.nn.sigmoid(gates[:, 0 * H:1 * H])
            f = jax.nn.sigmoid(gates[:, 1 * H:2 * H])
            g = jnp.tanh(gates[:, 2 * H:3 * H])
            o = jax.nn.sigmoid(gates[:, 3 * H:4 * H])
            c = f * c + i * g
            h = o * jnp.tanh(c)
            hs.append(h)
        inp = jnp.stack(hs, axis=1)
    h_last = inp[:, -1, :]
    logits = jnp.sum(h_last * params["w_out"], axis=-1, keepdims=True)
    return jax.nn.sigmoid(logits + params["b_out"])


# ----------------------------------------------------------------------------
if __name__ == "__main__":
    # Small shapes consistent with the module's forward (batch_first=True).
    B, T = 2, 8          # batch, sequence length
    INPUT_DIM = 4        # input_dim
    HIDDEN = 32          # kwargs['disc_hidden']
    N_LAYERS = 2         # kwargs['n_layers']
    # TODO(synk): nn.LSTM inter-layer dropout (training-mode only) is omitted —
    # this implements the eval-mode forward, where dropout is identity.

    key = jax.random.PRNGKey(0)
    key, kx = jax.random.split(key)
    x = jax.random.normal(kx, (B, T, INPUT_DIM), jnp.float32)
    params = init_params(key, INPUT_DIM, HIDDEN, N_LAYERS)

    out = lstm_discriminator_forward(x, params, N_LAYERS)
    out = jax.block_until_ready(out)

    ref = reference_forward(x, params, N_LAYERS)
    assert out.shape == (B, 1), out.shape
    assert jnp.allclose(out, ref, atol=1e-4, rtol=1e-4), (out, ref)

    print("KERNEL_OK")
</pallas_src>

<mosaic_0001>
module attributes {stable_mosaic.version = 11 : i64} {
  func.func @kernel(%arg0: memref<64x4xf32, #tpu.memory_space<vmem>>, %arg1: memref<4x128xf32, #tpu.memory_space<vmem>>, %arg2: memref<32x128xf32, #tpu.memory_space<vmem>>, %arg3: memref<1x128xf32, #tpu.memory_space<vmem>>, %arg4: memref<32x128xf32, #tpu.memory_space<vmem>>, %arg5: memref<32x128xf32, #tpu.memory_space<vmem>>, %arg6: memref<1x128xf32, #tpu.memory_space<vmem>>, %arg7: memref<1x32xf32, #tpu.memory_space<vmem>>, %arg8: memref<1x1xf32, #tpu.memory_space<vmem>>, %arg9: memref<8x1xf32, #tpu.memory_space<vmem>>, %arg10: memref<64x32xf32, #tpu.memory_space<vmem>>) attributes {dimension_semantics = [], scalar_prefetch = 0 : i64, scratch_operands = 1 : i64, tpu.core_type = #tpu.core_type<tc>} {
    %c0 = arith.constant 0 : index
    %c0_0 = arith.constant 0 : index
    %0 = vector.load %arg1[%c0, %c0_0] : memref<4x128xf32, #tpu.memory_space<vmem>>, vector<4x128xf32>
    %c0_1 = arith.constant 0 : index
    %c0_2 = arith.constant 0 : index
    %1 = vector.load %arg2[%c0_1, %c0_2] : memref<32x128xf32, #tpu.memory_space<vmem>>, vector<32x128xf32>
    %c0_3 = arith.constant 0 : index
    %c0_4 = arith.constant 0 : index
    %2 = vector.load %arg3[%c0_3, %c0_4] : memref<1x128xf32, #tpu.memory_space<vmem>>, vector<1x128xf32>
    %c0_5 = arith.constant 0 : index
    %c0_6 = arith.constant 0 : index
    %3 = vector.load %arg0[%c0_5, %c0_6] : memref<64x4xf32, #tpu.memory_space<vmem>>, vector<64x4xf32>
    %cst = arith.constant dense<0.000000e+00> : vector<64x128xf32>
    %4 = tpu.matmul %3, %0, %cst {dimension_numbers = #tpu.dot_dimension_numbers<[1], [0], [0], [1], [0, 0, 1, 1], [], []>} : vector<64x4xf32>, vector<4x128xf32>, vector<64x128xf32> -> vector<64x128xf32>
    %5 = vector.broadcast %2 : vector<1x128xf32> to vector<64x128xf32>
    %6 = arith.addf %4, %5 : vector<64x128xf32>
    %cst_7 = arith.constant 0.000000e+00 : f32
    %7 = vector.broadcast %cst_7 : f32 to vector<8x32xf32>
    %cst_8 = arith.constant 0.000000e+00 : f32
    %8 = vector.broadcast %cst_8 : f32 to vector<8x32xf32>
    %9 = vector.extract_strided_slice %6 {offsets = [0, 0], sizes = [8, 128], strides = [1, 1]} : vector<64x128xf32> to vector<8x128xf32>
    %cst_9 = arith.constant dense<0.000000e+00> : vector<8x128xf32>
    %10 = tpu.matmul %7, %1, %cst_9 {dimension_numbers = #tpu.dot_dimension_numbers<[1], [0], [0], [1], [0, 0, 1, 1], [], []>} : vector<8x32xf32>, vector<32x128xf32>, vector<8x128xf32> -> vector<8x128xf32>
    %11 = arith.addf %9, %10 : vector<8x128xf32>
    %12 = arith.negf %11 : vector<8x128xf32>
    %13 = math.exp %12 : vector<8x128xf32>
    %cst_10 = arith.constant 1.000000e+00 : f32
    %14 = vector.broadcast %cst_10 : f32 to vector<8x128xf32>
    %15 = arith.addf %14, %13 : vector<8x128xf32>
    %16 = arith.divf %14, %15 : vector<8x128xf32>
    %17 = math.tanh %11 : vector<8x128xf32>
    %18 = vector.extract_strided_slice %16 {offsets = [0, 0], sizes = [8, 32], strides = [1, 1]} : vector<8x128xf32> to vector<8x32xf32>
    %19 = vector.extract_strided_slice %16 {offsets = [0, 32], sizes = [8, 32], strides = [1, 1]} : vector<8x128xf32> to vector<8x32xf32>
    %20 = vector.extract_strided_slice %17 {offsets = [0, 64], sizes = [8, 32], strides = [1, 1]} : vector<8x128xf32> to vector<8x32xf32>
    %21 = vector.extract_strided_slice %16 {offsets = [0, 96], sizes = [8, 32], strides = [1, 1]} : vector<8x128xf32> to vector<8x32xf32>
    %22 = arith.mulf %19, %8 : vector<8x32xf32>
    %23 = arith.mulf %18, %20 : vector<8x32xf32>
    %24 = arith.addf %22, %23 : vector<8x32xf32>
    %25 = math.tanh %24 : vector<8x32xf32>
    %26 = arith.mulf %21, %25 : vector<8x32xf32>
    %c0_11 = arith.constant 0 : index
    %c0_12 = arith.constant 0 : index
    %27 = vector.load %arg10[%c0_11, %c0_12] : memref<64x32xf32, #tpu.memory_space<vmem>>, vector<8x32xf32>
    tpu.vector_store %arg10[%c0_11, %c0_12], %26 {strides = array<i32>} : memref<64x32xf32, #tpu.memory_space<vmem>>, vector<8x32xf32>,
    %28 = vector.extract_strided_slice %6 {offsets = [8, 0], sizes = [8, 128], strides = [1, 1]} : vector<64x128xf32> to vector<8x128xf32>
    %cst_13 = arith.constant dense<0.000000e+00> : vector<8x128xf32>
    %29 = tpu.matmul %26, %1, %cst_13 {dimension_numbers = #tpu.dot_dimension_numbers<[1], [0], [0], [1], [0, 0, 1, 1], [], []>} : vector<8x32xf32>, vector<32x128xf32>, vector<8x128xf32> -> vector<8x128xf32>
    %30 = arith.addf %28, %29 : vector<8x128xf32>
    %31 = arith.negf %30 : vector<8x128xf32>
    %32 = math.exp %31 : vector<8x128xf32>
    %cst_14 = arith.constant 1.000000e+00 : f32
    %33 = vector.broadcast %cst_14 : f32 to vector<8x128xf32>
    %34 = arith.addf %33, %32 : vector<8x128xf32>
    %35 = arith.divf %33, %34 : vector<8x128xf32>
    %36 = math.tanh %30 : vector<8x128xf32>
    %37 = vector.extract_strided_slice %35 {offsets = [0, 0], sizes = [8, 32], strides = [1, 1]} : vector<8x128xf32> to vector<8x32xf32>
    %38 = vector.extract_strided_slice %35 {offsets = [0, 32], sizes = [8, 32], strides = [1, 1]} : vector<8x128xf32> to vector<8x32xf32>
    %39 = vector.extract_strided_slice %36 {offsets = [0, 64], sizes = [8, 32], strides = [1, 1]} : vector<8x128xf32> to vector<8x32xf32>
    %40 = vector.extract_strided_slice %35 {offsets = [0, 96], sizes = [8, 32], strides = [1, 1]} : vector<8x128xf32> to vector<8x32xf32>
    %41 = arith.mulf %38, %24 : vector<8x32xf32>
    %42 = arith.mulf %37, %39 : vector<8x32xf32>
    %43 = arith.addf %41, %42 : vector<8x32xf32>
    %44 = math.tanh %43 : vector<8x32xf32>
    %45 = arith.mulf %40, %44 : vector<8x32xf32>
    %c8 = arith.constant 8 : index
    %c0_15 = arith.constant 0 : index
    %46 = vector.load %arg10[%c8, %c0_15] : memref<64x32xf32, #tpu.memory_space<vmem>>, vector<8x32xf32>
    tpu.vector_store %arg10[%c8, %c0_15], %45 {strides = array<i32>} : memref<64x32xf32, #tpu.memory_space<vmem>>, vector<8x32xf32>,
    %47 = vector.extract_strided_slice %6 {offsets = [16, 0], sizes = [8, 128], strides = [1, 1]} : vector<64x128xf32> to vector<8x128xf32>
    %cst_16 = arith.constant dense<0.000000e+00> : vector<8x128xf32>
    %48 = tpu.matmul %45, %1, %cst_16 {dimension_numbers = #tpu.dot_dimension_numbers<[1], [0], [0], [1], [0, 0, 1, 1], [], []>} : vector<8x32xf32>, vector<32x128xf32>, vector<8x128xf32> -> vector<8x128xf32>
    %49 = arith.addf %47, %48 : vector<8x128xf32>
    %50 = arith.negf %49 : vector<8x128xf32>
    %51 = math.exp %50 : vector<8x128xf32>
    %cst_17 = arith.constant 1.000000e+00 : f32
    %52 = vector.broadcast %cst_17 : f32 to vector<8x128xf32>
    %53 = arith.addf %52, %51 : vector<8x128xf32>
    %54 = arith.divf %52, %53 : vector<8x128xf32>
    %55 = math.tanh %49 : vector<8x128xf32>
    %56 = vector.extract_strided_slice %54 {offsets = [0, 0], sizes = [8, 32], strides = [1, 1]} : vector<8x128xf32> to vector<8x32xf32>
    %57 = vector.extract_strided_slice %54 {offsets = [0, 32], sizes = [8, 32], strides = [1, 1]} : vector<8x128xf32> to vector<8x32xf32>
    %58 = vector.extract_strided_slice %55 {offsets = [0, 64], sizes = [8, 32], strides = [1, 1]} : vector<8x128xf32> to vector<8x32xf32>
    %59 = vector.extract_strided_slice %54 {offsets = [0, 96], sizes = [8, 32], strides = [1, 1]} : vector<8x128xf32> to vector<8x32xf32>
    %60 = arith.mulf %57, %43 : vector<8x32xf32>
    %61 = arith.mulf %56, %58 : vector<8x32xf32>
    %62 = arith.addf %60, %61 : vector<8x32xf32>
    %63 = math.tanh %62 : vector<8x32xf32>
    %64 = arith.mulf %59, %63 : vector<8x32xf32>
    %c16 = arith.constant 16 : index
    %c0_18 = arith.constant 0 : index
    %65 = vector.load %arg10[%c16, %c0_18] : memref<64x32xf32, #tpu.memory_space<vmem>>, vector<8x32xf32>
    tpu.vector_store %arg10[%c16, %c0_18], %64 {strides = array<i32>} : memref<64x32xf32, #tpu.memory_space<vmem>>, vector<8x32xf32>,
    %66 = vector.extract_strided_slice %6 {offsets = [24, 0], sizes = [8, 128], strides = [1, 1]} : vector<64x128xf32> to vector<8x128xf32>
    %cst_19 = arith.constant dense<0.000000e+00> : vector<8x128xf32>
    %67 = tpu.matmul %64, %1, %cst_19 {dimension_numbers = #tpu.dot_dimension_numbers<[1], [0], [0], [1], [0, 0, 1, 1], [], []>} : vector<8x32xf32>, vector<32x128xf32>, vector<8x128xf32> -> vector<8x128xf32>
    %68 = arith.addf %66, %67 : vector<8x128xf32>
    %69 = arith.negf %68 : vector<8x128xf32>
    %70 = math.exp %69 : vector<8x128xf32>
    %cst_20 = arith.constant 1.000000e+00 : f32
    %71 = vector.broadcast %cst_20 : f32 to vector<8x128xf32>
    %72 = arith.addf %71, %70 : vector<8x128xf32>
    %73 = arith.divf %71, %72 : vector<8x128xf32>
    %74 = math.tanh %68 : vector<8x128xf32>
    %75 = vector.extract_strided_slice %73 {offsets = [0, 0], sizes = [8, 32], strides = [1, 1]} : vector<8x128xf32> to vector<8x32xf32>
    %76 = vector.extract_strided_slice %73 {offsets = [0, 32], sizes = [8, 32], strides = [1, 1]} : vector<8x128xf32> to vector<8x32xf32>
    %77 = vector.extract_strided_slice %74 {offsets = [0, 64], sizes = [8, 32], strides = [1, 1]} : vector<8x128xf32> to vector<8x32xf32>
    %78 = vector.extract_strided_slice %73 {offsets = [0, 96], sizes = [8, 32], strides = [1, 1]} : vector<8x128xf32> to vector<8x32xf32>
    %79 = arith.mulf %76, %62 : vector<8x32xf32>
    %80 = arith.mulf %75, %77 : vector<8x32xf32>
    %81 = arith.addf %79, %80 : vector<8x32xf32>
    %82 = math.tanh %81 : vector<8x32xf32>
    %83 = arith.mulf %78, %82 : vector<8x32xf32>
    %c24 = arith.constant 24 : index
    %c0_21 = arith.constant 0 : index
    %84 = vector.load %arg10[%c24, %c0_21] : memref<64x32xf32, #tpu.memory_space<vmem>>, vector<8x32xf32>
    tpu.vector_store %arg10[%c24, %c0_21], %83 {strides = array<i32>} : memref<64x32xf32, #tpu.memory_space<vmem>>, vector<8x32xf32>,
    %85 = vector.extract_strided_slice %6 {offsets = [32, 0], sizes = [8, 128], strides = [1, 1]} : vector<64x128xf32> to vector<8x128xf32>
    %cst_22 = arith.constant dense<0.000000e+00> : vector<8x128xf32>
    %86 = tpu.matmul %83, %1, %cst_22 {dimension_numbers = #tpu.dot_dimension_numbers<[1], [0], [0], [1], [0, 0, 1, 1], [], []>} : vector<8x32xf32>, vector<32x128xf32>, vector<8x128xf32> -> vector<8x128xf32>
    %87 = arith.addf %85, %86 : vector<8x128xf32>
    %88 = arith.negf %87 : vector<8x128xf32>
    %89 = math.exp %88 : vector<8x128xf32>
    %cst_23 = arith.constant 1.000000e+00 : f32
    %90 = vector.broadcast %cst_23 : f32 to vector<8x128xf32>
    %91 = arith.addf %90, %89 : vector<8x128xf32>
    %92 = arith.divf %90, %91 : vector<8x128xf32>
    %93 = math.tanh %87 : vector<8x128xf32>
    %94 = vector.extract_strided_slice %92 {offsets = [0, 0], sizes = [8, 32], strides = [1, 1]} : vector<8x128xf32> to vector<8x32xf32>
    %95 = vector.extract_strided_slice %92 {offsets = [0, 32], sizes = [8, 32], strides = [1, 1]} : vector<8x128xf32> to vector<8x32xf32>
    %96 = vector.extract_strided_slice %93 {offsets = [0, 64], sizes = [8, 32], strides = [1, 1]} : vector<8x128xf32> to vector<8x32xf32>
    %97 = vector.extract_strided_slice %92 {offsets = [0, 96], sizes = [8, 32], strides = [1, 1]} : vector<8x128xf32> to vector<8x32xf32>
    %98 = arith.mulf %95, %81 : vector<8x32xf32>
    %99 = arith.mulf %94, %96 : vector<8x32xf32>
    %100 = arith.addf %98, %99 : vector<8x32xf32>
    %101 = math.tanh %100 : vector<8x32xf32>
    %102 = arith.mulf %97, %101 : vector<8x32xf32>
    %c32 = arith.constant 32 : index
    %c0_24 = arith.constant 0 : index
    %103 = vector.load %arg10[%c32, %c0_24] : memref<64x32xf32, #tpu.memory_space<vmem>>, vector<8x32xf32>
    tpu.vector_store %arg10[%c32, %c0_24], %102 {strides = array<i32>} : memref<64x32xf32, #tpu.memory_space<vmem>>, vector<8x32xf32>,
    %104 = vector.extract_strided_slice %6 {offsets = [40, 0], sizes = [8, 128], strides = [1, 1]} : vector<64x128xf32> to vector<8x128xf32>
    %cst_25 = arith.constant dense<0.000000e+00> : vector<8x128xf32>
    %105 = tpu.matmul %102, %1, %cst_25 {dimension_numbers = #tpu.dot_dimension_numbers<[1], [0], [0], [1], [0, 0, 1, 1], [], []>} : vector<8x32xf32>, vector<32x128xf32>, vector<8x128xf32> -> vector<8x128xf32>
    %106 = arith.addf %104, %105 : vector<8x128xf32>
    %107 = arith.negf %106 : vector<8x128xf32>
    %108 = math.exp %107 : vector<8x128xf32>
    %cst_26 = arith.constant 1.000000e+00 : f32
    %109 = vector.broadcast %cst_26 : f32 to vector<8x128xf32>
    %110 = arith.addf %109, %108 : vector<8x128xf32>
    %111 = arith.divf %109, %110 : vector<8x128xf32>
    %112 = math.tanh %106 : vector<8x128xf32>
    %113 = vector.extract_strided_slice %111 {offsets = [0, 0], sizes = [8, 32], strides = [1, 1]} : vector<8x128xf32> to vector<8x32xf32>
    %114 = vector.extract_strided_slice %111 {offsets = [0, 32], sizes = [8, 32], strides = [1, 1]} : vector<8x128xf32> to vector<8x32xf32>
    %115 = vector.extract_strided_slice %112 {offsets = [0, 64], sizes = [8, 32], strides = [1, 1]} : vector<8x128xf32> to vector<8x32xf32>
    %116 = vector.extract_strided_slice %111 {offsets = [0, 96], sizes = [8, 32], strides = [1, 1]} : vector<8x128xf32> to vector<8x32xf32>
    %117 = arith.mulf %114, %100 : vector<8x32xf32>
    %118 = arith.mulf %113, %115 : vector<8x32xf32>
    %119 = arith.addf %117, %118 : vector<8x32xf32>
    %120 = math.tanh %119 : vector<8x32xf32>
    %121 = arith.mulf %116, %120 : vector<8x32xf32>
    %c40 = arith.constant 40 : index
    %c0_27 = arith.constant 0 : index
    %122 = vector.load %arg10[%c40, %c0_27] : memref<64x32xf32, #tpu.memory_space<vmem>>, vector<8x32xf32>
    tpu.vector_store %arg10[%c40, %c0_27], %121 {strides = array<i32>} : memref<64x32xf32, #tpu.memory_space<vmem>>, vector<8x32xf32>,
    %123 = vector.extract_strided_slice %6 {offsets = [48, 0], sizes = [8, 128], strides = [1, 1]} : vector<64x128xf32> to vector<8x128xf32>
    %cst_28 = arith.constant dense<0.000000e+00> : vector<8x128xf32>
    %124 = tpu.matmul %121, %1, %cst_28 {dimension_numbers = #tpu.dot_dimension_numbers<[1], [0], [0], [1], [0, 0, 1, 1], [], []>} : vector<8x32xf32>, vector<32x128xf32>, vector<8x128xf32> -> vector<8x128xf32>
    %125 = arith.addf %123, %124 : vector<8x128xf32>
    %126 = arith.negf %125 : vector<8x128xf32>
    %127 = math.exp %126 : vector<8x128xf32>
    %cst_29 = arith.constant 1.000000e+00 : f32
    %128 = vector.broadcast %cst_29 : f32 to vector<8x128xf32>
    %129 = arith.addf %128, %127 : vector<8x128xf32>
    %130 = arith.divf %128, %129 : vector<8x128xf32>
    %131 = math.tanh %125 : vector<8x128xf32>
    %132 = vector.extract_strided_slice %130 {offsets = [0, 0], sizes = [8, 32], strides = [1, 1]} : vector<8x128xf32> to vector<8x32xf32>
    %133 = vector.extract_strided_slice %130 {offsets = [0, 32], sizes = [8, 32], strides = [1, 1]} : vector<8x128xf32> to vector<8x32xf32>
    %134 = vector.extract_strided_slice %131 {offsets = [0, 64], sizes = [8, 32], strides = [1, 1]} : vector<8x128xf32> to vector<8x32xf32>
    %135 = vector.extract_strided_slice %130 {offsets = [0, 96], sizes = [8, 32], strides = [1, 1]} : vector<8x128xf32> to vector<8x32xf32>
    %136 = arith.mulf %133, %119 : vector<8x32xf32>
    %137 = arith.mulf %132, %134 : vector<8x32xf32>
    %138 = arith.addf %136, %137 : vector<8x32xf32>
    %139 = math.tanh %138 : vector<8x32xf32>
    %140 = arith.mulf %135, %139 : vector<8x32xf32>
    %c48 = arith.constant 48 : index
    %c0_30 = arith.constant 0 : index
    %141 = vector.load %arg10[%c48, %c0_30] : memref<64x32xf32, #tpu.memory_space<vmem>>, vector<8x32xf32>
    tpu.vector_store %arg10[%c48, %c0_30], %140 {strides = array<i32>} : memref<64x32xf32, #tpu.memory_space<vmem>>, vector<8x32xf32>,
    %142 = vector.extract_strided_slice %6 {offsets = [56, 0], sizes = [8, 128], strides = [1, 1]} : vector<64x128xf32> to vector<8x128xf32>
    %cst_31 = arith.constant dense<0.000000e+00> : vector<8x128xf32>
    %143 = tpu.matmul %140, %1, %cst_31 {dimension_numbers = #tpu.dot_dimension_numbers<[1], [0], [0], [1], [0, 0, 1, 1], [], []>} : vector<8x32xf32>, vector<32x128xf32>, vector<8x128xf32> -> vector<8x128xf32>
    %144 = arith.addf %142, %143 : vector<8x128xf32>
    %145 = arith.negf %144 : vector<8x128xf32>
    %146 = math.exp %145 : vector<8x128xf32>
    %cst_32 = arith.constant 1.000000e+00 : f32
    %147 = vector.broadcast %cst_32 : f32 to vector<8x128xf32>
    %148 = arith.addf %147, %146 : vector<8x128xf32>
    %149 = arith.divf %147, %148 : vector<8x128xf32>
    %150 = math.tanh %144 : vector<8x128xf32>
    %151 = vector.extract_strided_slice %149 {offsets = [0, 0], sizes = [8, 32], strides = [1, 1]} : vector<8x128xf32> to vector<8x32xf32>
    %152 = vector.extract_strided_slice %149 {offsets = [0, 32], sizes = [8, 32], strides = [1, 1]} : vector<8x128xf32> to vector<8x32xf32>
    %153 = vector.extract_strided_slice %150 {offsets = [0, 64], sizes = [8, 32], strides = [1, 1]} : vector<8x128xf32> to vector<8x32xf32>
    %154 = vector.extract_strided_slice %149 {offsets = [0, 96], sizes = [8, 32], strides = [1, 1]} : vector<8x128xf32> to vector<8x32xf32>
    %155 = arith.mulf %152, %138 : vector<8x32xf32>
    %156 = arith.mulf %151, %153 : vector<8x32xf32>
    %157 = arith.addf %155, %156 : vector<8x32xf32>
    %158 = math.tanh %157 : vector<8x32xf32>
    %159 = arith.mulf %154, %158 : vector<8x32xf32>
    %c56 = arith.constant 56 : index
    %c0_33 = arith.constant 0 : index
    %160 = vector.load %arg10[%c56, %c0_33] : memref<64x32xf32, #tpu.memory_space<vmem>>, vector<8x32xf32>
    tpu.vector_store %arg10[%c56, %c0_33], %159 {strides = array<i32>} : memref<64x32xf32, #tpu.memory_space<vmem>>, vector<8x32xf32>,
    %c0_34 = arith.constant 0 : index
    %c0_35 = arith.constant 0 : index
    %161 = vector.load %arg4[%c0_34, %c0_35] : memref<32x128xf32, #tpu.memory_space<vmem>>, vector<32x128xf32>
    %c0_36 = arith.constant 0 : index
    %c0_37 = arith.constant 0 : index
    %162 = vector.load %arg5[%c0_36, %c0_37] : memref<32x128xf32, #tpu.memory_space<vmem>>, vector<32x128xf32>
    %c0_38 = arith.constant 0 : index
    %c0_39 = arith.constant 0 : index
    %163 = vector.load %arg6[%c0_38, %c0_39] : memref<1x128xf32, #tpu.memory_space<vmem>>, vector<1x128xf32>
    %c0_40 = arith.constant 0 : index
    %c0_41 = arith.constant 0 : index
    %164 = vector.load %arg10[%c0_40, %c0_41] : memref<64x32xf32, #tpu.memory_space<vmem>>, vector<64x32xf32>
    %cst_42 = arith.constant dense<0.000000e+00> : vector<64x128xf32>
    %165 = tpu.matmul %164, %161, %cst_42 {dimension_numbers = #tpu.dot_dimension_numbers<[1], [0], [0], [1], [0, 0, 1, 1], [], []>} : vector<64x32xf32>, vector<32x128xf32>, vector<64x128xf32> -> vector<64x128xf32>
    %166 = vector.broadcast %163 : vector<1x128xf32> to vector<64x128xf32>
    %167 = arith.addf %165, %166 : vector<64x128xf32>
    %cst_43 = arith.constant 0.000000e+00 : f32
    %168 = vector.broadcast %cst_43 : f32 to vector<8x32xf32>
    %cst_44 = arith.constant 0.000000e+00 : f32
    %169 = vector.broadcast %cst_44 : f32 to vector<8x32xf32>
    %170 = vector.extract_strided_slice %167 {offsets = [0, 0], sizes = [8, 128], strides = [1, 1]} : vector<64x128xf32> to vector<8x128xf32>
    %cst_45 = arith.constant dense<0.000000e+00> : vector<8x128xf32>
    %171 = tpu.matmul %168, %162, %cst_45 {dimension_numbers = #tpu.dot_dimension_numbers<[1], [0], [0], [1], [0, 0, 1, 1], [], []>} : vector<8x32xf32>, vector<32x128xf32>, vector<8x128xf32> -> vector<8x128xf32>
    %172 = arith.addf %170, %171 : vector<8x128xf32>
    %173 = arith.negf %172 : vector<8x128xf32>
    %174 = math.exp %173 : vector<8x128xf32>
    %cst_46 = arith.constant 1.000000e+00 : f32
    %175 = vector.broadcast %cst_46 : f32 to vector<8x128xf32>
    %176 = arith.addf %175, %174 : vector<8x128xf32>
    %177 = arith.divf %175, %176 : vector<8x128xf32>
    %178 = math.tanh %172 : vector<8x128xf32>
    %179 = vector.extract_strided_slice %177 {offsets = [0, 0], sizes = [8, 32], strides = [1, 1]} : vector<8x128xf32> to vector<8x32xf32>
    %180 = vector.extract_strided_slice %177 {offsets = [0, 32], sizes = [8, 32], strides = [1, 1]} : vector<8x128xf32> to vector<8x32xf32>
    %181 = vector.extract_strided_slice %178 {offsets = [0, 64], sizes = [8, 32], strides = [1, 1]} : vector<8x128xf32> to vector<8x32xf32>
    %182 = vector.extract_strided_slice %177 {offsets = [0, 96], sizes = [8, 32], strides = [1, 1]} : vector<8x128xf32> to vector<8x32xf32>
    %183 = arith.mulf %180, %169 : vector<8x32xf32>
    %184 = arith.mulf %179, %181 : vector<8x32xf32>
    %185 = arith.addf %183, %184 : vector<8x32xf32>
    %186 = math.tanh %185 : vector<8x32xf32>
    %187 = arith.mulf %182, %186 : vector<8x32xf32>
    %188 = vector.extract_strided_slice %167 {offsets = [8, 0], sizes = [8, 128], strides = [1, 1]} : vector<64x128xf32> to vector<8x128xf32>
    %cst_47 = arith.constant dense<0.000000e+00> : vector<8x128xf32>
    %189 = tpu.matmul %187, %162, %cst_47 {dimension_numbers = #tpu.dot_dimension_numbers<[1], [0], [0], [1], [0, 0, 1, 1], [], []>} : vector<8x32xf32>, vector<32x128xf32>, vector<8x128xf32> -> vector<8x128xf32>
    %190 = arith.addf %188, %189 : vector<8x128xf32>
    %191 = arith.negf %190 : vector<8x128xf32>
    %192 = math.exp %191 : vector<8x128xf32>
    %cst_48 = arith.constant 1.000000e+00 : f32
    %193 = vector.broadcast %cst_48 : f32 to vector<8x128xf32>
    %194 = arith.addf %193, %192 : vector<8x128xf32>
    %195 = arith.divf %193, %194 : vector<8x128xf32>
    %196 = math.tanh %190 : vector<8x128xf32>
    %197 = vector.extract_strided_slice %195 {offsets = [0, 0], sizes = [8, 32], strides = [1, 1]} : vector<8x128xf32> to vector<8x32xf32>
    %198 = vector.extract_strided_slice %195 {offsets = [0, 32], sizes = [8, 32], strides = [1, 1]} : vector<8x128xf32> to vector<8x32xf32>
    %199 = vector.extract_strided_slice %196 {offsets = [0, 64], sizes = [8, 32], strides = [1, 1]} : vector<8x128xf32> to vector<8x32xf32>
    %200 = vector.extract_strided_slice %195 {offsets = [0, 96], sizes = [8, 32], strides = [1, 1]} : vector<8x128xf32> to vector<8x32xf32>
    %201 = arith.mulf %198, %185 : vector<8x32xf32>
    %202 = arith.mulf %197, %199 : vector<8x32xf32>
    %203 = arith.addf %201, %202 : vector<8x32xf32>
    %204 = math.tanh %203 : vector<8x32xf32>
    %205 = arith.mulf %200, %204 : vector<8x32xf32>
    %206 = vector.extract_strided_slice %167 {offsets = [16, 0], sizes = [8, 128], strides = [1, 1]} : vector<64x128xf32> to vector<8x128xf32>
    %cst_49 = arith.constant dense<0.000000e+00> : vector<8x128xf32>
    %207 = tpu.matmul %205, %162, %cst_49 {dimension_numbers = #tpu.dot_dimension_numbers<[1], [0], [0], [1], [0, 0, 1, 1], [], []>} : vector<8x32xf32>, vector<32x128xf32>, vector<8x128xf32> -> vector<8x128xf32>
    %208 = arith.addf %206, %207 : vector<8x128xf32>
    %209 = arith.negf %208 : vector<8x128xf32>
    %210 = math.exp %209 : vector<8x128xf32>
    %cst_50 = arith.constant 1.000000e+00 : f32
    %211 = vector.broadcast %cst_50 : f32 to vector<8x128xf32>
    %212 = arith.addf %211, %210 : vector<8x128xf32>
    %213 = arith.divf %211, %212 : vector<8x128xf32>
    %214 = math.tanh %208 : vector<8x128xf32>
    %215 = vector.extract_strided_slice %213 {offsets = [0, 0], sizes = [8, 32], strides = [1, 1]} : vector<8x128xf32> to vector<8x32xf32>
    %216 = vector.extract_strided_slice %213 {offsets = [0, 32], sizes = [8, 32], strides = [1, 1]} : vector<8x128xf32> to vector<8x32xf32>
    %217 = vector.extract_strided_slice %214 {offsets = [0, 64], sizes = [8, 32], strides = [1, 1]} : vector<8x128xf32> to vector<8x32xf32>
    %218 = vector.extract_strided_slice %213 {offsets = [0, 96], sizes = [8, 32], strides = [1, 1]} : vector<8x128xf32> to vector<8x32xf32>
    %219 = arith.mulf %216, %203 : vector<8x32xf32>
    %220 = arith.mulf %215, %217 : vector<8x32xf32>
    %221 = arith.addf %219, %220 : vector<8x32xf32>
    %222 = math.tanh %221 : vector<8x32xf32>
    %223 = arith.mulf %218, %222 : vector<8x32xf32>
    %224 = vector.extract_strided_slice %167 {offsets = [24, 0], sizes = [8, 128], strides = [1, 1]} : vector<64x128xf32> to vector<8x128xf32>
    %cst_51 = arith.constant dense<0.000000e+00> : vector<8x128xf32>
    %225 = tpu.matmul %223, %162, %cst_51 {dimension_numbers = #tpu.dot_dimension_numbers<[1], [0], [0], [1], [0, 0, 1, 1], [], []>} : vector<8x32xf32>, vector<32x128xf32>, vector<8x128xf32> -> vector<8x128xf32>
    %226 = arith.addf %224, %225 : vector<8x128xf32>
    %227 = arith.negf %226 : vector<8x128xf32>
    %228 = math.exp %227 : vector<8x128xf32>
    %cst_52 = arith.constant 1.000000e+00 : f32
    %229 = vector.broadcast %cst_52 : f32 to vector<8x128xf32>
    %230 = arith.addf %229, %228 : vector<8x128xf32>
    %231 = arith.divf %229, %230 : vector<8x128xf32>
    %232 = math.tanh %226 : vector<8x128xf32>
    %233 = vector.extract_strided_slice %231 {offsets = [0, 0], sizes = [8, 32], strides = [1, 1]} : vector<8x128xf32> to vector<8x32xf32>
    %234 = vector.extract_strided_slice %231 {offsets = [0, 32], sizes = [8, 32], strides = [1, 1]} : vector<8x128xf32> to vector<8x32xf32>
    %235 = vector.extract_strided_slice %232 {offsets = [0, 64], sizes = [8, 32], strides = [1, 1]} : vector<8x128xf32> to vector<8x32xf32>
    %236 = vector.extract_strided_slice %231 {offsets = [0, 96], sizes = [8, 32], strides = [1, 1]} : vector<8x128xf32> to vector<8x32xf32>
    %237 = arith.mulf %234, %221 : vector<8x32xf32>
    %238 = arith.mulf %233, %235 : vector<8x32xf32>
    %239 = arith.addf %237, %238 : vector<8x32xf32>
    %240 = math.tanh %239 : vector<8x32xf32>
    %241 = arith.mulf %236, %240 : vector<8x32xf32>
    %242 = vector.extract_strided_slice %167 {offsets = [32, 0], sizes = [8, 128], strides = [1, 1]} : vector<64x128xf32> to vector<8x128xf32>
    %cst_53 = arith.constant dense<0.000000e+00> : vector<8x128xf32>
    %243 = tpu.matmul %241, %162, %cst_53 {dimension_numbers = #tpu.dot_dimension_numbers<[1], [0], [0], [1], [0, 0, 1, 1], [], []>} : vector<8x32xf32>, vector<32x128xf32>, vector<8x128xf32> -> vector<8x128xf32>
    %244 = arith.addf %242, %243 : vector<8x128xf32>
    %245 = arith.negf %244 : vector<8x128xf32>
    %246 = math.exp %245 : vector<8x128xf32>
    %cst_54 = arith.constant 1.000000e+00 : f32
    %247 = vector.broadcast %cst_54 : f32 to vector<8x128xf32>
    %248 = arith.addf %247, %246 : vector<8x128xf32>
    %249 = arith.divf %247, %248 : vector<8x128xf32>
    %250 = math.tanh %244 : vector<8x128xf32>
    %251 = vector.extract_strided_slice %249 {offsets = [0, 0], sizes = [8, 32], strides = [1, 1]} : vector<8x128xf32> to vector<8x32xf32>
    %252 = vector.extract_strided_slice %249 {offsets = [0, 32], sizes = [8, 32], strides = [1, 1]} : vector<8x128xf32> to vector<8x32xf32>
    %253 = vector.extract_strided_slice %250 {offsets = [0, 64], sizes = [8, 32], strides = [1, 1]} : vector<8x128xf32> to vector<8x32xf32>
    %254 = vector.extract_strided_slice %249 {offsets = [0, 96], sizes = [8, 32], strides = [1, 1]} : vector<8x128xf32> to vector<8x32xf32>
    %255 = arith.mulf %252, %239 : vector<8x32xf32>
    %256 = arith.mulf %251, %253 : vector<8x32xf32>
    %257 = arith.addf %255, %256 : vector<8x32xf32>
    %258 = math.tanh %257 : vector<8x32xf32>
    %259 = arith.mulf %254, %258 : vector<8x32xf32>
    %260 = vector.extract_strided_slice %167 {offsets = [40, 0], sizes = [8, 128], strides = [1, 1]} : vector<64x128xf32> to vector<8x128xf32>
    %cst_55 = arith.constant dense<0.000000e+00> : vector<8x128xf32>
    %261 = tpu.matmul %259, %162, %cst_55 {dimension_numbers = #tpu.dot_dimension_numbers<[1], [0], [0], [1], [0, 0, 1, 1], [], []>} : vector<8x32xf32>, vector<32x128xf32>, vector<8x128xf32> -> vector<8x128xf32>
    %262 = arith.addf %260, %261 : vector<8x128xf32>
    %263 = arith.negf %262 : vector<8x128xf32>
    %264 = math.exp %263 : vector<8x128xf32>
    %cst_56 = arith.constant 1.000000e+00 : f32
    %265 = vector.broadcast %cst_56 : f32 to vector<8x128xf32>
    %266 = arith.addf %265, %264 : vector<8x128xf32>
    %267 = arith.divf %265, %266 : vector<8x128xf32>
    %268 = math.tanh %262 : vector<8x128xf32>
    %269 = vector.extract_strided_slice %267 {offsets = [0, 0], sizes = [8, 32], strides = [1, 1]} : vector<8x128xf32> to vector<8x32xf32>
    %270 = vector.extract_strided_slice %267 {offsets = [0, 32], sizes = [8, 32], strides = [1, 1]} : vector<8x128xf32> to vector<8x32xf32>
    %271 = vector.extract_strided_slice %268 {offsets = [0, 64], sizes = [8, 32], strides = [1, 1]} : vector<8x128xf32> to vector<8x32xf32>
    %272 = vector.extract_strided_slice %267 {offsets = [0, 96], sizes = [8, 32], strides = [1, 1]} : vector<8x128xf32> to vector<8x32xf32>
    %273 = arith.mulf %270, %257 : vector<8x32xf32>
    %274 = arith.mulf %269, %271 : vector<8x32xf32>
    %275 = arith.addf %273, %274 : vector<8x32xf32>
    %276 = math.tanh %275 : vector<8x32xf32>
    %277 = arith.mulf %272, %276 : vector<8x32xf32>
    %278 = vector.extract_strided_slice %167 {offsets = [48, 0], sizes = [8, 128], strides = [1, 1]} : vector<64x128xf32> to vector<8x128xf32>
    %cst_57 = arith.constant dense<0.000000e+00> : vector<8x128xf32>
    %279 = tpu.matmul %277, %162, %cst_57 {dimension_numbers = #tpu.dot_dimension_numbers<[1], [0], [0], [1], [0, 0, 1, 1], [], []>} : vector<8x32xf32>, vector<32x128xf32>, vector<8x128xf32> -> vector<8x128xf32>
    %280 = arith.addf %278, %279 : vector<8x128xf32>
    %281 = arith.negf %280 : vector<8x128xf32>
    %282 = math.exp %281 : vector<8x128xf32>
    %cst_58 = arith.constant 1.000000e+00 : f32
    %283 = vector.broadcast %cst_58 : f32 to vector<8x128xf32>
    %284 = arith.addf %283, %282 : vector<8x128xf32>
    %285 = arith.divf %283, %284 : vector<8x128xf32>
    %286 = math.tanh %280 : vector<8x128xf32>
    %287 = vector.extract_strided_slice %285 {offsets = [0, 0], sizes = [8, 32], strides = [1, 1]} : vector<8x128xf32> to vector<8x32xf32>
    %288 = vector.extract_strided_slice %285 {offsets = [0, 32], sizes = [8, 32], strides = [1, 1]} : vector<8x128xf32> to vector<8x32xf32>
    %289 = vector.extract_strided_slice %286 {offsets = [0, 64], sizes = [8, 32], strides = [1, 1]} : vector<8x128xf32> to vector<8x32xf32>
    %290 = vector.extract_strided_slice %285 {offsets = [0, 96], sizes = [8, 32], strides = [1, 1]} : vector<8x128xf32> to vector<8x32xf32>
    %291 = arith.mulf %288, %275 : vector<8x32xf32>
    %292 = arith.mulf %287, %289 : vector<8x32xf32>
    %293 = arith.addf %291, %292 : vector<8x32xf32>
    %294 = math.tanh %293 : vector<8x32xf32>
    %295 = arith.mulf %290, %294 : vector<8x32xf32>
    %296 = vector.extract_strided_slice %167 {offsets = [56, 0], sizes = [8, 128], strides = [1, 1]} : vector<64x128xf32> to vector<8x128xf32>
    %cst_59 = arith.constant dense<0.000000e+00> : vector<8x128xf32>
    %297 = tpu.matmul %295, %162, %cst_59 {dimension_numbers = #tpu.dot_dimension_numbers<[1], [0], [0], [1], [0, 0, 1, 1], [], []>} : vector<8x32xf32>, vector<32x128xf32>, vector<8x128xf32> -> vector<8x128xf32>
    %298 = arith.addf %296, %297 : vector<8x128xf32>
    %299 = arith.negf %298 : vector<8x128xf32>
    %300 = math.exp %299 : vector<8x128xf32>
    %cst_60 = arith.constant 1.000000e+00 : f32
    %301 = vector.broadcast %cst_60 : f32 to vector<8x128xf32>
    %302 = arith.addf %301, %300 : vector<8x128xf32>
    %303 = arith.divf %301, %302 : vector<8x128xf32>
    %304 = math.tanh %298 : vector<8x128xf32>
    %305 = vector.extract_strided_slice %303 {offsets = [0, 0], sizes = [8, 32], strides = [1, 1]} : vector<8x128xf32> to vector<8x32xf32>
    %306 = vector.extract_strided_slice %303 {offsets = [0, 32], sizes = [8, 32], strides = [1, 1]} : vector<8x128xf32> to vector<8x32xf32>
    %307 = vector.extract_strided_slice %304 {offsets = [0, 64], sizes = [8, 32], strides = [1, 1]} : vector<8x128xf32> to vector<8x32xf32>
    %308 = vector.extract_strided_slice %303 {offsets = [0, 96], sizes = [8, 32], strides = [1, 1]} : vector<8x128xf32> to vector<8x32xf32>
    %309 = arith.mulf %306, %293 : vector<8x32xf32>
    %310 = arith.mulf %305, %307 : vector<8x32xf32>
    %311 = arith.addf %309, %310 : vector<8x32xf32>
    %312 = math.tanh %311 : vector<8x32xf32>
    %313 = arith.mulf %308, %312 : vector<8x32xf32>
    %c0_61 = arith.constant 0 : index
    %c0_62 = arith.constant 0 : index
    %314 = vector.load %arg7[%c0_61, %c0_62] : memref<1x32xf32, #tpu.memory_space<vmem>>, vector<1x32xf32>
    %315 = vector.broadcast %314 : vector<1x32xf32> to vector<8x32xf32>
    %316 = arith.mulf %313, %315 : vector<8x32xf32>
    %cst_63 = arith.constant dense<0.000000e+00> : vector<8xf32>
    %317 = vector.multi_reduction <add>, %316, %cst_63 [1] : vector<8x32xf32> to vector<8xf32>
    %318 = vector.shape_cast %317 : vector<8xf32> to vector<8x1xf32>
    %c0_64 = arith.constant 0 : index
    %c0_65 = arith.constant 0 : index
    %319 = vector.load %arg8[%c0_64, %c0_65] : memref<1x1xf32, #tpu.memory_space<vmem>>, vector<1x1xf32>
    %320 = vector.broadcast %319 : vector<1x1xf32> to vector<8x1xf32>
    %321 = arith.addf %318, %320 : vector<8x1xf32>
    %322 = arith.negf %321 : vector<8x1xf32>
    %323 = math.exp %322 : vector<8x1xf32>
    %cst_66 = arith.constant 1.000000e+00 : f32
    %324 = vector.broadcast %cst_66 : f32 to vector<8x1xf32>
    %325 = arith.addf %324, %323 : vector<8x1xf32>
    %326 = arith.divf %324, %325 : vector<8x1xf32>
    %c0_67 = arith.constant 0 : index
    %c0_68 = arith.constant 0 : index
    %327 = vector.load %arg9[%c0_67, %c0_68] : memref<8x1xf32, #tpu.memory_space<vmem>>, vector<8x1xf32>
    tpu.vector_store %arg9[%c0_67, %c0_68], %326 {strides = array<i32>} : memref<8x1xf32, #tpu.memory_space<vmem>>, vector<8x1xf32>,
    return
  }
}

</mosaic_0001>

<bundles_post_ra>
// kernel: lstm_discriminator_forward.1
= control target key start
LH: loop header
LB: loop body
LE: loop exit
PB: predicated region body
PF: predicated region fallthrough
CT: control target
= control target key end

     0   :  { %vm79_vm0 = vcmask 1043456   ;;  %vm54_vm1 = vcmask 31744   ;;  %v2490_v0 = vmov 0.0   ;;  %vm2491_vm2 = vmmov 0   ;;  %s2492_s23 = smov 64   ;;  %s2494_s30 = smov 96   ;;  %s2955_s1 = inlined_call_operand.vmem [shape: f32[4,128], index: 1, kind: input, shape index: {}]   ;;  %s2956_s2 = inlined_call_operand.vmem [shape: f32[32,128], index: 2, kind: input, shape index: {}]   ;;  %s2957_s0 = inlined_call_operand.vmem [shape: f32[64,4], index: 0, kind: input, shape index: {}]   ;;  %s2958_s3 = inlined_call_operand.vmem [shape: f32[1,128], index: 3, kind: input, shape index: {}]   ;;  %s2959_s4 = inlined_call_operand.vmem [shape: f32[32,128], index: 4, kind: input, shape index: {}]   ;;  %s2960_s5 = inlined_call_operand.vmem [shape: f32[32,128], index: 5, kind: input, shape index: {}]   ;;  %s2961_s6 = inlined_call_operand.vmem [shape: f32[1,128], index: 6, kind: input, shape index: {}]   ;;  %s2962_s7 = inlined_call_operand.vmem [shape: f32[1,32], index: 7, kind: input, shape index: {}]   ;;  %s2963_s8 = inlined_call_operand.<no memory space> [shape: f32[1,1], index: 8, kind: input, shape index: {}]   ;;  %s2964_s9 = inlined_call_operand.vmem [shape: f32[8,1], index: 9, kind: output, shape index: {}]  }
   0x1   :  { %2157 = vmatprep.subr.mxu1 %v2490_v0  ;;  %v34_v1 = vld [vmem:[%s2955_s1] sm:$0xf]  ;;  %v2552_v2 = vld [vmem:[%s2956_s2 + $0x18] sm:$0xff]  ;;  %2165 = vmatprep.mubr.msk.f32.mxu1 %vm2491_vm2, %v2490_v0  ;;  %v41_v4 = vld [vmem:[%s2957_s0 + $0x8] sm:$0xff]  ;;  %vm188_vm3 = vcmask 261120   ;;  %vm1984_vm4 = vcmask 7168  }
   0x2   :  { %v40_v3 = vld [vmem:[%s2957_s0] sm:$0xff]  ;;  %2143 = vmatprep.subr.msk.mxu0 %vm79_vm0, %v34_v1  ;;  %2158 = vmatpush3.msra.mxu1 %v2552_v2  ;;  %v2566_v5 = vld [vmem:[%s2956_s2 + $0x10] sm:$0xff]  ;;  %v2574_v6 = vld [vmem:[%s2956_s2 + $0x8] sm:$0xff] }
   0x3   :  { %2144 = vmatpush3.msk.msra.mxu0 %vm79_vm0, %v34_v1  ;;  %2145 = vmatprep.mubr.msk.f32.mxu0 %vm54_vm1, %v40_v3  ;;  %v2582_v7 = vld [vmem:[%s2956_s2] sm:$0xff]  ;;  %v42_v43 = vld [vmem:[%s2957_s0 + $0x10] sm:$0xff]  ;;  %v43_v44 = vld [vmem:[%s2957_s0 + $0x18] sm:$0xff] }
   0x4   :  { %2159 = vmatprep.subr.mxu1 %v2490_v0  ;;  %2146 = vmatmul.mubr.msk.f32.vlgmr.msra.gmra.mxu0 %vm54_vm1, %v41_v4  ;;  %v2610_v9 = vld [vmem:[%s2958_s3] ss:$0 sm:$0xff]  ;;  %s2493_s3 = smov 32   ;;  %v45_v46 = vld [vmem:[%s2957_s0 + $0x28] sm:$0xff]  ;;  %v46_v47 = vld [vmem:[%s2957_s0 + $0x30] sm:$0xff] }
   0x5   :  { %2160 = vmatpush3.msra.mxu1 %v2566_v5  ;;  %2179 = vmatprep.subr.mxu0 %v2490_v0  ;;  %v44_v45 = vld [vmem:[%s2957_s0 + $0x20] sm:$0xff]  ;;  %v47_v48 = vld [vmem:[%s2957_s0 + $0x38] sm:$0xff] }
   0x6   :  { %2161 = vmatprep.subr.mxu1 %v2490_v0  ;;  %2180 = vmatpush3.msra.mxu0 %v2552_v2 }
   0x7   :  { %2162 = vmatpush3.msra.mxu1 %v2574_v6  ;;  %2181 = vmatprep.subr.mxu0 %v2490_v0 }
   0x8   :  { %2163 = vmatprep.subr.mxu1 %v2490_v0  ;;  %2182 = vmatpush3.msra.mxu0 %v2566_v5 }
   0x9   :  { %2164 = vmatpush3.msra.mxu1 %v2582_v7  ;;  %2183 = vmatprep.subr.mxu0 %v2490_v0 }
   0xa   :  { %2166 = vmatmul.mubr.f32.vlgmr.msra.gmra.mxu1 %v2490_v0  ;;  %2168 = vmatprep.subr.mxu1 %v2490_v0 }
   0xb   :  { %2169 = vmatpush3.msra.mxu1 %v2552_v2  ;;  %2176 = vmatprep.mubr.msk.f32.mxu1 %vm2491_vm2, %v2490_v0 }
   0xc   :  { %2170 = vmatprep.subr.mxu1 %v2490_v0  ;;  %2184 = vmatpush3.msra.mxu0 %v2574_v6 }
   0xd   :  { %2171 = vmatpush3.msra.mxu1 %v2566_v5  ;;  %2185 = vmatprep.subr.mxu0 %v2490_v0 }
   0xe   :  { %2172 = vmatprep.subr.mxu1 %v2490_v0  ;;  %2186 = vmatpush3.msra.mxu0 %v2582_v7 }
   0xf   :  { %2173 = vmatpush3.msra.mxu1 %v2574_v6  ;;  %2201 = vmatprep.subr.mxu0 %v2490_v0 }
  0x10   :  { %2174 = vmatprep.subr.mxu1 %v2490_v0  ;;  %2148 = vmatprep.mubr.msk.f32.mxu0 %vm54_vm1, %v42_v43 }
  0x11   :  { %2175 = vmatpush3.msra.mxu1 %v2582_v7  ;;  %2149 = vmatmul.mubr.msk.f32.gmra.mxu0 %vm54_vm1, %v43_v44 }
  0x12   :  { %2190 = vmatprep.subr.mxu1 %v2490_v0  ;;  %2151 = vmatprep.mubr.msk.f32.mxu0 %vm54_vm1, %v44_v45 }
  0x15   :  { %2152 = vmatmul.mubr.msk.f32.gmra.mxu0 %vm54_vm1, %v45_v46 }
  0x16   :  { %2154 = vmatprep.mubr.msk.f32.mxu0 %vm54_vm1, %v46_v47 }
  0x19   :  { %2155 = vmatmul.mubr.msk.f32.gmra.mxu0 %vm54_vm1, %v47_v48 }
  0x1a   :  { %2187 = vmatprep.mubr.msk.f32.mxu0 %vm2491_vm2, %v2490_v0 }
  0xc4   :  { %v2147_v8 = vpop.f32.mrf.mxu0 }
  0xc5   :  { %v155_v29 = vadd.f32 %v2147_v8, %v2610_v9 }
  0xc6   :  { %v149_v10 = vpop.f32.mrf.mxu0 }
  0xc7   :  { %v150_v11 = vadd.f32 %v2610_v9, %v149_v10 }
  0xca   :  { %v258_v12 = vpop.f32.mrf.mxu1 }
  0xcb   :  { %v262_v13 = vadd.f32 %v258_v12, %v150_v11 }
  0xcc   :  { %v2167_v14 = vpop.f32.mrf.mxu1 }
  0xcd   :  { %2358 = vtanh.f32 %v262_v13  ;;  %v2000_v16 = vmul.f32 -1.442695, %v262_v13 }
  0xcf   :  { %2360 = vpow2.f32 %v2000_v16 }
  0xd1   :  { %v2150_v53 = vpop.f32.mrf.mxu0 }
  0xd3   :  { %v159_v54 = vpop.f32.mrf.mxu0 }
  0xd4   :  { %v160_v59 = vadd.f32 %v2610_v9, %v159_v54 }
  0xd5   :  { %v2672_v55 = vpop.f32.mrf.mxu0 }
  0xd7   :  { %v2674_v56 = vpop.f32.mrf.mxu0 }
  0xd9   :  { %v2676_v57 = vpop.f32.mrf.mxu0 }
  0xda   :  { %v2359_v15 = vpop.eup %2358 }
  0xdb   :  { %272 = vrot.lane.b32.xlu0 %v2359_v15, %s2492_s23  ;;  %v2678_v58 = vpop.f32.mrf.mxu0 }
  0xdc   :  { %v2361_v17 = vpop.eup %2360 }
  0xdd   :  { %v266_v18 = vadd.f32 1.0, %v2361_v17 }
  0xdf   :  { %2362 = vrcp.f32 %v266_v18 }
  0xec   :  { %v2363_v19 = vpop.eup %2362 }
  0xed   :  { %v270_v22 = vmul.f32 0.0, %v2363_v19 }
 0x14d   :  { %v273_v20 = vpop.permute.xlu0 %272 }
 0x14e   :  { %v275_v21 = vmul.f32 %v2363_v19, %v273_v20 }
 0x150   :  { %277 = vrot.lane.b32.xlu0 %v275_v21, %s2493_s3 }
 0x1c2   :  { %v278_v23 = vpop.permute.xlu0 %277 }
 0x1c3   :  { %v280_v24 = vadd.f32 %v278_v23, %v270_v22 }
 0x1c5   :  { %2364 = vtanh.f32 %v280_v24 }
 0x1d2   :  { %v2365_v25 = vpop.eup %2364 }
 0x1d3   :  { %283 = vrot.lane.b32.xlu1 %v2365_v25, %s2492_s23 }
 0x245   :  { %v284_v26 = vpop.permute.xlu1 %283 }
 0x246   :  { %v286_v27 = vmul.f32 %v2363_v19, %v284_v26  ;;  %v165_v19 = vadd.f32 %v2150_v53, %v2610_v9 }
 0x248   :  { %288 = vrot.lane.b32.xlu1 %v286_v27, %s2493_s3 }
 0x2ba   :  { %v289_v28 = vpop.permute.xlu1 %288 }
 0x2bb   :  { %291 = vst.msk [vmem:[#allocation2] sm:$0xff] %vm188_vm3, %v289_v28  ;;  %2177 = vmatmul.mubr.msk.f32.vlgmr.msra.gmra.mxu1 %vm188_vm3, %v289_v28 }
 0x2bc   :  { %2191 = vmatpush3.msra.mxu1 %v2552_v2  ;;  %2198 = vmatprep.mubr.msk.f32.mxu1 %vm2491_vm2, %v2490_v0 }
 0x2bd   :  { %2192 = vmatprep.subr.mxu1 %v2490_v0 }
 0x2be   :  { %2193 = vmatpush3.msra.mxu1 %v2566_v5 }
 0x2bf   :  { %2194 = vmatprep.subr.mxu1 %v2490_v0 }
 0x2c0   :  { %2195 = vmatpush3.msra.mxu1 %v2574_v6 }
 0x2c1   :  { %2196 = vmatprep.subr.mxu1 %v2490_v0 }
 0x2c2   :  { %2197 = vmatpush3.msra.mxu1 %v2582_v7 }
 0x2c3   :  { %2212 = vmatprep.subr.mxu1 %v2490_v0 }
 0x37b   :  { %v360_v30 = vpop.f32.mrf.mxu1 }
 0x37c   :  { %v364_v31 = vadd.f32 %v360_v30, %v155_v29 }
 0x37d   :  { %v2178_v32 = vpop.f32.mrf.mxu1 }
 0x37e   :  { %2366 = vtanh.f32 %v364_v31  ;;  %v2002_v34 = vmul.f32 -1.442695, %v364_v31 }
 0x380   :  { %2368 = vpow2.f32 %v2002_v34 }
 0x38b   :  { %v2367_v33 = vpop.eup %2366 }
 0x38c   :  { %374 = vrot.lane.b32.xlu0 %v2367_v33, %s2492_s23 }
 0x38d   :  { %v2369_v35 = vpop.eup %2368 }
 0x38e   :  { %v368_v36 = vadd.f32 1.0, %v2369_v35 }
 0x390   :  { %2370 = vrcp.f32 %v368_v36 }
 0x39d   :  { %v2371_v37 = vpop.eup %2370 }
 0x39e   :  { %v372_v40 = vmul.f32 %v2371_v37, %v280_v24 }
 0x3fe   :  { %v375_v38 = vpop.permute.xlu0 %374 }
 0x3ff   :  { %v377_v39 = vmul.f32 %v2371_v37, %v375_v38 }
 0x401   :  { %379 = vrot.lane.b32.xlu1 %v377_v39, %s2493_s3 }
 0x473   :  { %v380_v41 = vpop.permute.xlu1 %379 }
 0x474   :  { %v382_v42 = vadd.f32 %v380_v41, %v372_v40 }
 0x476   :  { %2372 = vtanh.f32 %v382_v42 }
 0x483   :  { %v2373_v49 = vpop.eup %2372 }
 0x484   :  { %385 = vrot.lane.b32.xlu0 %v2373_v49, %s2492_s23 }
 0x4f6   :  { %v386_v50 = vpop.permute.xlu0 %385 }
 0x4f7   :  { %v388_v51 = vmul.f32 %v2371_v37, %v386_v50  ;;  %v170_v37 = vadd.f32 %v2610_v9, %v2674_v56 }
 0x4f9   :  { %390 = vrot.lane.b32.xlu1 %v388_v51, %s2493_s3 }
 0x56b   :  { %v391_v52 = vpop.permute.xlu1 %390 }
 0x56c   :  { %393 = vst.msk [vmem:[#allocation2 + $0x8] sm:$0xff] %vm188_vm3, %v391_v52  ;;  %2188 = vmatmul.mubr.msk.f32.vlgmr.msra.gmra.mxu0 %vm188_vm3, %v391_v52 }
 0x56d   :  { %2202 = vmatpush3.msra.mxu0 %v2552_v2  ;;  %2209 = vmatprep.mubr.msk.f32.mxu0 %vm2491_vm2, %v2490_v0 }
 0x56e   :  { %2203 = vmatprep.subr.mxu0 %v2490_v0 }
 0x56f   :  { %2204 = vmatpush3.msra.mxu0 %v2566_v5 }
 0x570   :  { %2205 = vmatprep.subr.mxu0 %v2490_v0 }
 0x571   :  { %2206 = vmatpush3.msra.mxu0 %v2574_v6 }
 0x572   :  { %2207 = vmatprep.subr.mxu0 %v2490_v0 }
 0x573   :  { %2208 = vmatpush3.msra.mxu0 %v2582_v7 }
 0x574   :  { %2223 = vmatprep.subr.mxu0 %v2490_v0 }
 0x62c   :  { %v462_v60 = vpop.f32.mrf.mxu0 }
 0x62d   :  { %v466_v61 = vadd.f32 %v462_v60, %v160_v59 }
 0x62e   :  { %v2189_v62 = vpop.f32.mrf.mxu0 }
 0x62f   :  { %2374 = vtanh.f32 %v466_v61  ;;  %v2004_v1 = vmul.f32 -1.442695, %v466_v61 }
 0x631   :  { %2376 = vpow2.f32 %v2004_v1 }
 0x63c   :  { %v2375_v63 = vpop.eup %2374 }
 0x63d   :  { %476 = vrot.lane.b32.xlu0 %v2375_v63, %s2492_s23 }
 0x63e   :  { %v2377_v3 = vpop.eup %2376 }
 0x63f   :  { %v470_v4 = vadd.f32 1.0, %v2377_v3 }
 0x641   :  { %2378 = vrcp.f32 %v470_v4 }
 0x64e   :  { %v2379_v8 = vpop.eup %2378 }
 0x64f   :  { %v474_v12 = vmul.f32 %v2379_v8, %v382_v42 }
 0x6af   :  { %v477_v10 = vpop.permute.xlu0 %476 }
 0x6b0   :  { %v479_v11 = vmul.f32 %v2379_v8, %v477_v10 }
 0x6b2   :  { %481 = vrot.lane.b32.xlu1 %v479_v11, %s2493_s3 }
 0x724   :  { %v482_v13 = vpop.permute.xlu1 %481 }
 0x725   :  { %v484_v14 = vadd.f32 %v482_v13, %v474_v12 }
 0x727   :  { %2380 = vtanh.f32 %v484_v14 }
 0x734   :  { %v2381_v15 = vpop.eup %2380 }
 0x735   :  { %487 = vrot.lane.b32.xlu0 %v2381_v15, %s2492_s23  ;;  %v1015_v15 = vld [vmem:[#allocation2] sm:$0xff] }
 0x7a7   :  { %v488_v16 = vpop.permute.xlu0 %487 }
 0x7a8   :  { %v490_v17 = vmul.f32 %v2379_v8, %v488_v16  ;;  %v1009_v8 = vld [vmem:[%s2959_s4 + $0x18] sm:$0xff]  ;;  %v1007_v16 = vld [vmem:[%s2959_s4 + $0x8] sm:$0xff] }
 0x7aa   :  { %492 = vrot.lane.b32.xlu1 %v490_v17, %s2493_s3  ;;  %v1006_v17 = vld [vmem:[%s2959_s4] sm:$0xff] }
 0x81c   :  { %v493_v18 = vpop.permute.xlu1 %492 }
 0x81d   :  { %495 = vst.msk [vmem:[#allocation2 + $0x10] sm:$0xff] %vm188_vm3, %v493_v18  ;;  %2199 = vmatmul.mubr.msk.f32.vlgmr.msra.gmra.mxu1 %vm188_vm3, %v493_v18  ;;  %v1016_v18 = vld [vmem:[#allocation2 + $0x8] sm:$0xff] }
 0x81e   :  { %2213 = vmatpush3.msra.mxu1 %v2552_v2  ;;  %2220 = vmatprep.mubr.msk.f32.mxu1 %vm2491_vm2, %v2490_v0 }
 0x81f   :  { %2214 = vmatprep.subr.mxu1 %v2490_v0 }
 0x820   :  { %2215 = vmatpush3.msra.mxu1 %v2566_v5 }
 0x821   :  { %2216 = vmatprep.subr.mxu1 %v2490_v0 }
 0x822   :  { %2217 = vmatpush3.msra.mxu1 %v2574_v6 }
 0x823   :  { %2218 = vmatprep.subr.mxu1 %v2490_v0 }
 0x824   :  { %2219 = vmatpush3.msra.mxu1 %v2582_v7 }
 0x825   :  { %2234 = vmatprep.subr.mxu1 %v2490_v0 }
 0x8dd   :  { %v564_v20 = vpop.f32.mrf.mxu1 }
 0x8de   :  { %v568_v21 = vadd.f32 %v564_v20, %v165_v19  ;;  %v1017_v19 = vld [vmem:[#allocation2 + $0x10] sm:$0xff] }
 0x8df   :  { %v2200_v22 = vpop.f32.mrf.mxu1 }
 0x8e0   :  { %2382 = vtanh.f32 %v568_v21  ;;  %v2006_v24 = vmul.f32 -1.442695, %v568_v21 }
 0x8e2   :  { %2384 = vpow2.f32 %v2006_v24 }
 0x8ed   :  { %v2383_v23 = vpop.eup %2382 }
 0x8ee   :  { %578 = vrot.lane.b32.xlu0 %v2383_v23, %s2492_s23  ;;  %v180_v23 = vadd.f32 %v2610_v9, %v2678_v58 }
 0x8ef   :  { %v2385_v25 = vpop.eup %2384 }
 0x8f0   :  { %v572_v26 = vadd.f32 1.0, %v2385_v25 }
 0x8f2   :  { %2386 = vrcp.f32 %v572_v26 }
 0x8ff   :  { %v2387_v27 = vpop.eup %2386 }
 0x900   :  { %v576_v30 = vmul.f32 %v2387_v27, %v484_v14  ;;  %v1008_v14 = vld [vmem:[%s2959_s4 + $0x10] sm:$0xff] }
 0x960   :  { %v579_v28 = vpop.permute.xlu0 %578 }
 0x961   :  { %v581_v29 = vmul.f32 %v2387_v27, %v579_v28 }
 0x963   :  { %583 = vrot.lane.b32.xlu1 %v581_v29, %s2493_s3 }
 0x9d5   :  { %v584_v31 = vpop.permute.xlu1 %583 }
 0x9d6   :  { %v586_v32 = vadd.f32 %v584_v31, %v576_v30 }
 0x9d8   :  { %2388 = vtanh.f32 %v586_v32 }
 0x9e5   :  { %v2389_v33 = vpop.eup %2388 }
 0x9e6   :  { %589 = vrot.lane.b32.xlu0 %v2389_v33, %s2492_s23 }
 0xa58   :  { %v590_v34 = vpop.permute.xlu0 %589 }
 0xa59   :  { %v592_v35 = vmul.f32 %v2387_v27, %v590_v34 }
 0xa5b   :  { %594 = vrot.lane.b32.xlu1 %v592_v35, %s2493_s3 }
 0xacd   :  { %v595_v36 = vpop.permute.xlu1 %594 }
 0xace   :  { %597 = vst.msk [vmem:[#allocation2 + $0x18] sm:$0xff] %vm188_vm3, %v595_v36  ;;  %2210 = vmatmul.mubr.msk.f32.vlgmr.msra.gmra.mxu0 %vm188_vm3, %v595_v36 }
 0xacf   :  { %2224 = vmatpush3.msra.mxu0 %v2552_v2  ;;  %2231 = vmatprep.mubr.msk.f32.mxu0 %vm2491_vm2, %v2490_v0 }
 0xad0   :  { %2225 = vmatprep.subr.mxu0 %v2490_v0 }
 0xad1   :  { %2226 = vmatpush3.msra.mxu0 %v2566_v5 }
 0xad2   :  { %2227 = vmatprep.subr.mxu0 %v2490_v0 }
 0xad3   :  { %2228 = vmatpush3.msra.mxu0 %v2574_v6 }
 0xad4   :  { %2229 = vmatprep.subr.mxu0 %v2490_v0 }
 0xad5   :  { %2230 = vmatpush3.msra.mxu0 %v2582_v7  ;;  %v1018_v20 = vld [vmem:[#allocation2 + $0x18] sm:$0xff] }
 0xad6   :  { %2245 = vmatprep.subr.mxu0 %v1009_v8 }
 0xb8e   :  { %v666_v38 = vpop.f32.mrf.mxu0 }
 0xb8f   :  { %v670_v39 = vadd.f32 %v666_v38, %v170_v37  ;;  %v2769_v37 = vld [vmem:[%s2960_s5 + $0x18] sm:$0xff]  ;;  %v2775_v38 = vld [vmem:[%s2960_s5 + $0x10] sm:$0xff] }
 0xb90   :  { %v2211_v40 = vpop.f32.mrf.mxu0 }
 0xb91   :  { %2390 = vtanh.f32 %v670_v39  ;;  %v2008_v42 = vmul.f32 -1.442695, %v670_v39  ;;  %v2782_v39 = vld [vmem:[%s2960_s5 + $0x8] sm:$0xff]  ;;  %v2789_v40 = vld [vmem:[%s2960_s5] sm:$0xff] }
 0xb93   :  { %2392 = vpow2.f32 %v2008_v42 }
 0xb9e   :  { %v2391_v41 = vpop.eup %2390 }
 0xb9f   :  { %680 = vrot.lane.b32.xlu0 %v2391_v41, %s2492_s23 }
 0xba0   :  { %v2393_v43 = vpop.eup %2392 }
 0xba1   :  { %v674_v44 = vadd.f32 1.0, %v2393_v43 }
 0xba3   :  { %2394 = vrcp.f32 %v674_v44 }
 0xbb0   :  { %v2395_v45 = vpop.eup %2394 }
 0xbb1   :  { %v678_v48 = vmul.f32 %v2395_v45, %v586_v32 }
 0xc11   :  { %v681_v46 = vpop.permute.xlu0 %680 }
 0xc12   :  { %v683_v47 = vmul.f32 %v2395_v45, %v681_v46 }
 0xc14   :  { %685 = vrot.lane.b32.xlu1 %v683_v47, %s2493_s3 }
 0xc86   :  { %v686_v49 = vpop.permute.xlu1 %685 }
 0xc87   :  { %v688_v50 = vadd.f32 %v686_v49, %v678_v48 }
 0xc89   :  { %2396 = vtanh.f32 %v688_v50 }
 0xc96   :  { %v2397_v51 = vpop.eup %2396 }
 0xc97   :  { %691 = vrot.lane.b32.xlu0 %v2397_v51, %s2492_s23  ;;  %v2826_v51 = vld [vmem:[%s2961_s6] ss:$0 sm:$0xff] }
 0xd09   :  { %v692_v52 = vpop.permute.xlu0 %691 }
 0xd0a   :  { %v694_v53 = vmul.f32 %v2395_v45, %v692_v52  ;;  %v185_v45 = vadd.f32 %v2676_v57, %v2610_v9 }
 0xd0c   :  { %696 = vrot.lane.b32.xlu1 %v694_v53, %s2493_s3 }
 0xd7e   :  { %v697_v54 = vpop.permute.xlu1 %696 }
 0xd7f   :  { %699 = vst.msk [vmem:[#allocation2 + $0x20] sm:$0xff] %vm188_vm3, %v697_v54  ;;  %2221 = vmatmul.mubr.msk.f32.vlgmr.msra.gmra.mxu1 %vm188_vm3, %v697_v54 }
 0xd80   :  { %2235 = vmatpush3.msra.mxu1 %v2552_v2  ;;  %2242 = vmatprep.mubr.msk.f32.mxu1 %vm2491_vm2, %v2490_v0  ;;  %v175_v2 = vadd.f32 %v2672_v55, %v2610_v9 }
 0xd81   :  { %2236 = vmatprep.subr.mxu1 %v2490_v0 }
 0xd82   :  { %2237 = vmatpush3.msra.mxu1 %v2566_v5 }
 0xd83   :  { %2238 = vmatprep.subr.mxu1 %v2490_v0 }
 0xd84   :  { %2239 = vmatpush3.msra.mxu1 %v2574_v6 }
 0xd85   :  { %2240 = vmatprep.subr.mxu1 %v2490_v0 }
 0xd86   :  { %2241 = vmatpush3.msra.mxu1 %v2582_v7  ;;  %v1019_v21 = vld [vmem:[#allocation2 + $0x20] sm:$0xff] }
 0xd87   :  { %2265 = vmatprep.subr.mxu1 %v2490_v0 }
 0xe3f   :  { %v768_v56 = vpop.f32.mrf.mxu1 }
 0xe40   :  { %v772_v59 = vadd.f32 %v768_v56, %v175_v2 }
 0xe41   :  { %v2222_v60 = vpop.f32.mrf.mxu1 }
 0xe42   :  { %2398 = vtanh.f32 %v772_v59  ;;  %v2010_v5 = vmul.f32 -1.442695, %v772_v59 }
 0xe44   :  { %2400 = vpow2.f32 %v2010_v5 }
 0xe4f   :  { %v2399_v61 = vpop.eup %2398 }
 0xe50   :  { %782 = vrot.lane.b32.xlu0 %v2399_v61, %s2492_s23 }
 0xe51   :  { %v2401_v62 = vpop.eup %2400 }
 0xe52   :  { %v776_v6 = vadd.f32 1.0, %v2401_v62 }
 0xe54   :  { %2402 = vrcp.f32 %v776_v6 }
 0xe61   :  { %v2403_v63 = vpop.eup %2402 }
 0xe62   :  { %v780_v3 = vmul.f32 %v2403_v63, %v688_v50 }
 0xec2   :  { %v783_v1 = vpop.permute.xlu0 %782 }
 0xec3   :  { %v785_v7 = vmul.f32 %v2403_v63, %v783_v1 }
 0xec5   :  { %787 = vrot.lane.b32.xlu1 %v785_v7, %s2493_s3 }
 0xf37   :  { %v788_v4 = vpop.permute.xlu1 %787 }
 0xf38   :  { %v790_v55 = vadd.f32 %v788_v4, %v780_v3 }
 0xf3a   :  { %2404 = vtanh.f32 %v790_v55 }
 0xf47   :  { %v2405_v10 = vpop.eup %2404 }
 0xf48   :  { %793 = vrot.lane.b32.xlu0 %v2405_v10, %s2492_s23 }
 0xfba   :  { %v794_v11 = vpop.permute.xlu0 %793 }
 0xfbb   :  { %v796_v12 = vmul.f32 %v2403_v63, %v794_v11 }
 0xfbd   :  { %798 = vrot.lane.b32.xlu1 %v796_v12, %s2493_s3 }
0x102f   :  { %v799_v13 = vpop.permute.xlu1 %798 }
0x1030   :  { %801 = vst.msk [vmem:[#allocation2 + $0x28] sm:$0xff] %vm188_vm3, %v799_v13  ;;  %2232 = vmatmul.mubr.msk.f32.vlgmr.msra.gmra.mxu0 %vm188_vm3, %v799_v13 }
0x1031   :  { %2246 = vmatpush3.msra.mxu0 %v1009_v8  ;;  %2253 = vmatprep.mubr.msk.f32.mxu0 %vm188_vm3, %v1015_v15 }
0x1032   :  { %2247 = vmatprep.subr.mxu0 %v1008_v14 }
0x1033   :  { %2248 = vmatpush3.msra.mxu0 %v1008_v14 }
0x1034   :  { %2249 = vmatprep.subr.mxu0 %v1007_v16 }
0x1035   :  { %2250 = vmatpush3.msra.mxu0 %v1007_v16 }
0x1036   :  { %2251 = vmatprep.subr.mxu0 %v1006_v17 }
0x1037   :  { %2252 = vmatpush3.msra.mxu0 %v1006_v17  ;;  %v1020_v22 = vld [vmem:[#allocation2 + $0x28] sm:$0xff] }
0x1038   :  { %2254 = vmatmul.mubr.msk.f32.vlgmr.msra.gmra.mxu0 %vm188_vm3, %v1016_v18  ;;  %2287 = vmatprep.subr.mxu0 %v2490_v0 }
0x1039   :  { %2256 = vmatprep.mubr.msk.f32.mxu0 %vm188_vm3, %v1017_v19  ;;  %2288 = vmatpush3.msra.mxu0 %v2769_v37 }
0x103a   :  { %2289 = vmatprep.subr.mxu0 %v2490_v0 }
0x103b   :  { %2290 = vmatpush3.msra.mxu0 %v2775_v38 }
0x103c   :  { %2257 = vmatmul.mubr.msk.f32.gmra.mxu0 %vm188_vm3, %v1018_v20  ;;  %2291 = vmatprep.subr.mxu0 %v2490_v0 }
0x103d   :  { %2259 = vmatprep.mubr.msk.f32.mxu0 %vm188_vm3, %v1019_v21  ;;  %2292 = vmatpush3.msra.mxu0 %v2782_v39 }
0x103e   :  { %2293 = vmatprep.subr.mxu0 %v2490_v0 }
0x103f   :  { %2294 = vmatpush3.msra.mxu0 %v2789_v40 }
0x1040   :  { %2260 = vmatmul.mubr.msk.f32.gmra.mxu0 %vm188_vm3, %v1020_v22  ;;  %2309 = vmatprep.subr.mxu0 %v2490_v0 }
0x10f0   :  { %v870_v24 = vpop.f32.mrf.mxu0 }
0x10f1   :  { %v874_v25 = vadd.f32 %v870_v24, %v180_v23 }
0x10f2   :  { %v2233_v26 = vpop.f32.mrf.mxu0 }
0x10f3   :  { %2406 = vtanh.f32 %v874_v25  ;;  %v2012_v28 = vmul.f32 -1.442695, %v874_v25 }
0x10f5   :  { %2408 = vpow2.f32 %v2012_v28 }
0x10f8   :  { %v2821_v46 = vpop.f32.mrf.mxu0 }
0x10f9   :  { %v1125_v21 = vadd.f32 %v2821_v46, %v2826_v51 }
0x10fa   :  { %v1119_v50 = vpop.f32.mrf.mxu0 }
0x10fb   :  { %v1120_v52 = vadd.f32 %v2826_v51, %v1119_v50 }
0x1100   :  { %v2407_v27 = vpop.eup %2406 }
0x1101   :  { %884 = vrot.lane.b32.xlu0 %v2407_v27, %s2492_s23 }
0x1102   :  { %v2409_v29 = vpop.eup %2408 }
0x1103   :  { %v878_v30 = vadd.f32 1.0, %v2409_v29 }
0x1105   :  { %2410 = vrcp.f32 %v878_v30 }
0x1112   :  { %v2411_v31 = vpop.eup %2410 }
0x1113   :  { %v882_v34 = vmul.f32 %v2411_v31, %v790_v55 }
0x1173   :  { %v885_v32 = vpop.permute.xlu0 %884 }
0x1174   :  { %v887_v33 = vmul.f32 %v2411_v31, %v885_v32 }
0x1176   :  { %889 = vrot.lane.b32.xlu1 %v887_v33, %s2493_s3 }
0x11e8   :  { %v890_v35 = vpop.permute.xlu1 %889 }
0x11e9   :  { %v2762_v58 = vadd.f32 %v890_v35, %v882_v34 }
0x11eb   :  { %2412 = vtanh.f32 %v2762_v58 }
0x11f8   :  { %v2413_v36 = vpop.eup %2412 }
0x11f9   :  { %895 = vrot.lane.b32.xlu0 %v2413_v36, %s2492_s23 }
0x126b   :  { %v896_v41 = vpop.permute.xlu0 %895 }
0x126c   :  { %v898_v42 = vmul.f32 %v2411_v31, %v896_v41 }
0x126e   :  { %900 = vrot.lane.b32.xlu1 %v898_v42, %s2493_s3 }
0x12e0   :  { %v901_v43 = vpop.permute.xlu1 %900 }
0x12e1   :  { %903 = vst.msk [vmem:[#allocation2 + $0x30] sm:$0xff] %vm188_vm3, %v901_v43  ;;  %2243 = vmatmul.mubr.msk.f32.vlgmr.msra.gmra.mxu1 %vm188_vm3, %v901_v43 }
0x12e2   :  { %2266 = vmatpush3.msra.mxu1 %v2769_v37  ;;  %2273 = vmatprep.mubr.msk.f32.mxu1 %vm2491_vm2, %v2490_v0 }
0x12e3   :  { %2267 = vmatprep.subr.mxu1 %v2490_v0 }
0x12e4   :  { %2268 = vmatpush3.msra.mxu1 %v2775_v38 }
0x12e5   :  { %2269 = vmatprep.subr.mxu1 %v2490_v0 }
0x12e6   :  { %2270 = vmatpush3.msra.mxu1 %v2782_v39 }
0x12e7   :  { %2271 = vmatprep.subr.mxu1 %v2490_v0 }
0x12e8   :  { %2272 = vmatpush3.msra.mxu1 %v2789_v40  ;;  %v1021_v44 = vld [vmem:[#allocation2 + $0x30] sm:$0xff] }
0x12e9   :  { %2274 = vmatmul.mubr.f32.vlgmr.msra.gmra.mxu1 %v2490_v0  ;;  %2262 = vmatprep.mubr.msk.f32.mxu0 %vm188_vm3, %v1021_v44  ;;  %v2258_v44 = vpop.f32.mrf.mxu0 }
0x12ea   :  { %2276 = vmatprep.subr.mxu1 %v2490_v0  ;;  %2284 = vmatprep.mubr.msk.f32.mxu1 %vm2491_vm2, %v2490_v0 }
0x12eb   :  { %2277 = vmatpush3.msra.mxu1 %v2769_v37 }
0x12ec   :  { %2278 = vmatprep.subr.mxu1 %v2490_v0 }
0x12ed   :  { %2279 = vmatpush3.msra.mxu1 %v2775_v38 }
0x12ee   :  { %2280 = vmatprep.subr.mxu1 %v2490_v0 }
0x12ef   :  { %2281 = vmatpush3.msra.mxu1 %v2782_v39 }
0x12f0   :  { %2282 = vmatprep.subr.mxu1 %v2490_v0 }
0x12f1   :  { %2283 = vmatpush3.msra.mxu1 %v2789_v40 }
0x12f2   :  { %2298 = vmatprep.subr.mxu1 %v2490_v0 }
0x13a1   :  { %v972_v47 = vpop.f32.mrf.mxu1 }
0x13a2   :  { %v976_v48 = vadd.f32 %v972_v47, %v185_v45  ;;  %v1129_v45 = vpop.f32.mrf.mxu0 }
0x13a3   :  { %v2244_v49 = vpop.f32.mrf.mxu1  ;;  %v1130_v50 = vadd.f32 %v2826_v51, %v1129_v45 }
0x13a4   :  { %v2014_v3 = vmul.f32 -1.442695, %v976_v48  ;;  %v2870_v46 = vpop.f32.mrf.mxu0 }
0x13a6   :  { %v2872_v47 = vpop.f32.mrf.mxu0 }
0x13a9   :  { %v1224_v53 = vpop.f32.mrf.mxu1 }
0x13aa   :  { %v1228_v54 = vadd.f32 %v1224_v53, %v1120_v52 }
0x13ab   :  { %v2275_v2 = vpop.f32.mrf.mxu1 }
0x13ac   :  { %2414 = vtanh.f32 %v1228_v54  ;;  %v2024_v9 = vmul.f32 -1.442695, %v1228_v54 }
0x13ae   :  { %2416 = vpow2.f32 %v2024_v9 }
0x13b9   :  { %v2415_v56 = vpop.eup %2414 }
0x13ba   :  { %1238 = vrot.lane.b32.xlu0 %v2415_v56, %s2492_s23 }
0x13bb   :  { %v2417_v57 = vpop.eup %2416 }
0x13bc   :  { %v1232_v59 = vadd.f32 1.0, %v2417_v57 }
0x13be   :  { %2418 = vrcp.f32 %v1232_v59 }
0x13cb   :  { %v2419_v60 = vpop.eup %2418 }
0x13cc   :  { %v1236_v62 = vmul.f32 0.0, %v2419_v60 }
0x142c   :  { %v1239_v61 = vpop.permute.xlu0 %1238 }
0x142d   :  { %v1241_v5 = vmul.f32 %v2419_v60, %v1239_v61 }
0x142f   :  { %1243 = vrot.lane.b32.xlu1 %v1241_v5, %s2493_s3 }
0x14a1   :  { %v1244_v6 = vpop.permute.xlu1 %1243 }
0x14a2   :  { %v1246_v63 = vadd.f32 %v1244_v6, %v1236_v62 }
0x14a4   :  { %2420 = vtanh.f32 %v1246_v63 }
0x14a5   :  { %2422 = vtanh.f32 %v976_v48 }
0x14a6   :  { %2424 = vpow2.f32 %v2014_v3 }
0x14b1   :  { %v2421_v1 = vpop.eup %2420 }
0x14b2   :  { %1249 = vrot.lane.b32.xlu0 %v2421_v1, %s2492_s23  ;;  %v2423_v7 = vpop.eup %2422 }
0x14b3   :  { %v2425_v4 = vpop.eup %2424 }
0x14b4   :  { %v980_v55 = vadd.f32 1.0, %v2425_v4  ;;  %v1135_v4 = vadd.f32 %v2258_v44, %v2826_v51 }
0x14b6   :  { %986 = vrot.lane.b32.xlu0 %v2423_v7, %s2492_s23  ;;  %2426 = vrcp.f32 %v980_v55 }
0x14c3   :  { %v2427_v11 = vpop.eup %2426 }
0x14c4   :  { %v984_v15 = vmul.f32 %v2427_v11, %v2762_v58 }
0x1524   :  { %v1250_v8 = vpop.permute.xlu0 %1249 }
0x1525   :  { %v1252_v10 = vmul.f32 %v2419_v60, %v1250_v8 }
0x1527   :  { %1254 = vrot.lane.b32.xlu1 %v1252_v10, %s2493_s3 }
0x1528   :  { %v987_v12 = vpop.permute.xlu0 %986 }
0x1529   :  { %v989_v13 = vmul.f32 %v2427_v11, %v987_v12 }
0x152b   :  { %991 = vrot.lane.b32.xlu0 %v989_v13, %s2493_s3 }
0x1599   :  { %v1255_v14 = vpop.permute.xlu1 %1254 }
0x159a   :  { %2285 = vmatmul.mubr.msk.f32.vlgmr.msra.gmra.mxu1 %vm188_vm3, %v1255_v14 }
0x159b   :  { %2299 = vmatpush3.msra.mxu1 %v2769_v37  ;;  %2306 = vmatprep.mubr.msk.f32.mxu1 %vm2491_vm2, %v2490_v0 }
0x159c   :  { %2300 = vmatprep.subr.mxu1 %v2490_v0 }
0x159d   :  { %v992_v16 = vpop.permute.xlu0 %991  ;;  %2301 = vmatpush3.msra.mxu1 %v2775_v38 }
0x159e   :  { %v994_v17 = vadd.f32 %v992_v16, %v984_v15  ;;  %2302 = vmatprep.subr.mxu1 %v2490_v0 }
0x159f   :  { %2303 = vmatpush3.msra.mxu1 %v2782_v39 }
0x15a0   :  { %2428 = vtanh.f32 %v994_v17  ;;  %2304 = vmatprep.subr.mxu1 %v2490_v0 }
0x15a1   :  { %2305 = vmatpush3.msra.mxu1 %v2789_v40 }
0x15a2   :  { %2320 = vmatprep.subr.mxu1 %v2490_v0 }
0x15ad   :  { %v2429_v18 = vpop.eup %2428 }
0x15ae   :  { %997 = vrot.lane.b32.xlu0 %v2429_v18, %s2492_s23 }
0x1620   :  { %v998_v19 = vpop.permute.xlu0 %997 }
0x1621   :  { %v1000_v20 = vmul.f32 %v2427_v11, %v998_v19 }
0x1623   :  { %1002 = vrot.lane.b32.xlu0 %v1000_v20, %s2493_s3 }
0x165a   :  { %v1324_v22 = vpop.f32.mrf.mxu1 }
0x165b   :  { %v1328_v23 = vadd.f32 %v1324_v22, %v1125_v21 }
0x165c   :  { %v2286_v24 = vpop.f32.mrf.mxu1 }
0x165d   :  { %2430 = vtanh.f32 %v1328_v23  ;;  %v2026_v28 = vmul.f32 -1.442695, %v1328_v23 }
0x165f   :  { %2432 = vpow2.f32 %v2026_v28 }
0x166a   :  { %v2431_v25 = vpop.eup %2430 }
0x166b   :  { %1338 = vrot.lane.b32.xlu1 %v2431_v25, %s2492_s23  ;;  %v1140_v25 = vadd.f32 %v2826_v51, %v2872_v47  ;;  %v1145_v47 = vadd.f32 %v2870_v46, %v2826_v51 }
0x166c   :  { %v2433_v29 = vpop.eup %2432 }
0x166d   :  { %v1332_v30 = vadd.f32 1.0, %v2433_v29 }
0x166f   :  { %2434 = vrcp.f32 %v1332_v30 }
0x167c   :  { %v2435_v31 = vpop.eup %2434 }
0x167d   :  { %v1336_v34 = vmul.f32 %v2435_v31, %v1246_v63 }
0x1695   :  { %v1003_v26 = vpop.permute.xlu0 %1002 }
0x1696   :  { %1005 = vst.msk [vmem:[#allocation2 + $0x38] sm:$0xff] %vm188_vm3, %v1003_v26 }
0x169d   :  { %v1022_v27 = vld [vmem:[#allocation2 + $0x38] sm:$0xff] }
0x169e   :  { %2263 = vmatmul.mubr.msk.f32.gmra.mxu0 %vm188_vm3, %v1022_v27 }
0x169f   :  { %2295 = vmatprep.mubr.msk.f32.mxu0 %vm2491_vm2, %v2490_v0 }
0x16dd   :  { %v1339_v32 = vpop.permute.xlu1 %1338 }
0x16de   :  { %v1341_v33 = vmul.f32 %v2435_v31, %v1339_v32 }
0x16e0   :  { %1343 = vrot.lane.b32.xlu1 %v1341_v33, %s2493_s3 }
0x1752   :  { %v1344_v35 = vpop.permute.xlu1 %1343 }
0x1753   :  { %v1346_v58 = vadd.f32 %v1344_v35, %v1336_v34 }
0x1755   :  { %2436 = vtanh.f32 %v1346_v58 }
0x175e   :  { %v2874_v48 = vpop.f32.mrf.mxu0 }
0x1760   :  { %v2876_v49 = vpop.f32.mrf.mxu0 }
0x1762   :  { %v2437_v36 = vpop.eup %2436 }
0x1763   :  { %1349 = vrot.lane.b32.xlu1 %v2437_v36, %s2492_s23 }
0x17d5   :  { %v1350_v41 = vpop.permute.xlu1 %1349 }
0x17d6   :  { %v1352_v42 = vmul.f32 %v2435_v31, %v1350_v41 }
0x17d8   :  { %1354 = vrot.lane.b32.xlu1 %v1352_v42, %s2493_s3 }
0x184a   :  { %v1355_v43 = vpop.permute.xlu1 %1354 }
0x184b   :  { %2296 = vmatmul.mubr.msk.f32.vlgmr.msra.gmra.mxu0 %vm188_vm3, %v1355_v43 }
0x184c   :  { %2310 = vmatpush3.msra.mxu0 %v2769_v37  ;;  %2317 = vmatprep.mubr.msk.f32.mxu0 %vm2491_vm2, %v2490_v0 }
0x184d   :  { %2311 = vmatprep.subr.mxu0 %v2490_v0 }
0x184e   :  { %2312 = vmatpush3.msra.mxu0 %v2775_v38 }
0x184f   :  { %2313 = vmatprep.subr.mxu0 %v2490_v0 }
0x1850   :  { %2314 = vmatpush3.msra.mxu0 %v2782_v39 }
0x1851   :  { %2315 = vmatprep.subr.mxu0 %v2490_v0 }
0x1852   :  { %2316 = vmatpush3.msra.mxu0 %v2789_v40 }
0x1853   :  { %2331 = vmatprep.subr.mxu0 %v2490_v0 }
0x190b   :  { %v1424_v52 = vpop.f32.mrf.mxu0 }
0x190c   :  { %v1428_v53 = vadd.f32 %v1424_v52, %v1130_v50 }
0x190d   :  { %v2297_v54 = vpop.f32.mrf.mxu0 }
0x190e   :  { %2438 = vtanh.f32 %v1428_v53  ;;  %v2028_v56 = vmul.f32 -1.442695, %v1428_v53 }
0x1910   :  { %2440 = vpow2.f32 %v2028_v56 }
0x191b   :  { %v2439_v2 = vpop.eup %2438 }
0x191c   :  { %1438 = vrot.lane.b32.xlu0 %v2439_v2, %s2492_s23 }
0x191d   :  { %v2441_v9 = vpop.eup %2440 }
0x191e   :  { %v1432_v57 = vadd.f32 1.0, %v2441_v9 }
0x1920   :  { %2442 = vrcp.f32 %v1432_v57 }
0x192d   :  { %v2443_v59 = vpop.eup %2442 }
0x192e   :  { %v1436_v5 = vmul.f32 %v2443_v59, %v1346_v58 }
0x198e   :  { %v1439_v60 = vpop.permute.xlu0 %1438 }
0x198f   :  { %v1441_v61 = vmul.f32 %v2443_v59, %v1439_v60 }
0x1991   :  { %1443 = vrot.lane.b32.xlu1 %v1441_v61, %s2493_s3 }
0x1a03   :  { %v1444_v62 = vpop.permute.xlu1 %1443 }
0x1a04   :  { %v1446_v6 = vadd.f32 %v1444_v62, %v1436_v5  ;;  %v1150_v5 = vadd.f32 %v2826_v51, %v2876_v49 }
0x1a06   :  { %2444 = vtanh.f32 %v1446_v6 }
0x1a13   :  { %v2445_v63 = vpop.eup %2444 }
0x1a14   :  { %1449 = vrot.lane.b32.xlu0 %v2445_v63, %s2492_s23 }
0x1a86   :  { %v1450_v1 = vpop.permute.xlu0 %1449 }
0x1a87   :  { %v1452_v7 = vmul.f32 %v2443_v59, %v1450_v1 }
0x1a89   :  { %1454 = vrot.lane.b32.xlu1 %v1452_v7, %s2493_s3 }
0x1afb   :  { %v1455_v3 = vpop.permute.xlu1 %1454 }
0x1afc   :  { %2307 = vmatmul.mubr.msk.f32.vlgmr.msra.gmra.mxu1 %vm188_vm3, %v1455_v3 }
0x1afd   :  { %2321 = vmatpush3.msra.mxu1 %v2769_v37  ;;  %2328 = vmatprep.mubr.msk.f32.mxu1 %vm2491_vm2, %v2490_v0 }
0x1afe   :  { %2322 = vmatprep.subr.mxu1 %v2490_v0 }
0x1aff   :  { %2323 = vmatpush3.msra.mxu1 %v2775_v38 }
0x1b00   :  { %2324 = vmatprep.subr.mxu1 %v2490_v0 }
0x1b01   :  { %2325 = vmatpush3.msra.mxu1 %v2782_v39 }
0x1b02   :  { %2326 = vmatprep.subr.mxu1 %v2490_v0 }
0x1b03   :  { %2327 = vmatpush3.msra.mxu1 %v2789_v40 }
0x1b04   :  { %2342 = vmatprep.subr.mxu1 %v2490_v0 }
0x1bbc   :  { %v1524_v55 = vpop.f32.mrf.mxu1 }
0x1bbd   :  { %v1528_v8 = vadd.f32 %v1524_v55, %v1135_v4 }
0x1bbe   :  { %v2308_v10 = vpop.f32.mrf.mxu1 }
0x1bbf   :  { %2446 = vtanh.f32 %v1528_v8  ;;  %v2030_v12 = vmul.f32 -1.442695, %v1528_v8 }
0x1bc1   :  { %2448 = vpow2.f32 %v2030_v12 }
0x1bcc   :  { %v2447_v11 = vpop.eup %2446 }
0x1bcd   :  { %1538 = vrot.lane.b32.xlu0 %v2447_v11, %s2492_s23 }
0x1bce   :  { %v2449_v13 = vpop.eup %2448 }
0x1bcf   :  { %v1532_v14 = vadd.f32 1.0, %v2449_v13 }
0x1bd1   :  { %2450 = vrcp.f32 %v1532_v14 }
0x1bde   :  { %v2451_v15 = vpop.eup %2450 }
0x1bdf   :  { %v1536_v18 = vmul.f32 %v2451_v15, %v1446_v6 }
0x1c3f   :  { %v1539_v16 = vpop.permute.xlu0 %1538 }
0x1c40   :  { %v1541_v17 = vmul.f32 %v2451_v15, %v1539_v16 }
0x1c42   :  { %1543 = vrot.lane.b32.xlu1 %v1541_v17, %s2493_s3  ;;  %v1155_v17 = vadd.f32 %v2874_v48, %v2826_v51  ;;  %v2039_v51 = vld [vmem:[%s2962_s7] ss:$0 sm:$0xff] }
0x1cb4   :  { %v1544_v19 = vpop.permute.xlu1 %1543 }
0x1cb5   :  { %v1546_v20 = vadd.f32 %v1544_v19, %v1536_v18 }
0x1cb7   :  { %2452 = vtanh.f32 %v1546_v20 }
0x1cc4   :  { %v2453_v21 = vpop.eup %2452 }
0x1cc5   :  { %1549 = vrot.lane.b32.xlu0 %v2453_v21, %s2492_s23 }
0x1d37   :  { %v1550_v22 = vpop.permute.xlu0 %1549 }
0x1d38   :  { %v1552_v23 = vmul.f32 %v2451_v15, %v1550_v22 }
0x1d3a   :  { %1554 = vrot.lane.b32.xlu1 %v1552_v23, %s2493_s3 }
0x1dac   :  { %v1555_v24 = vpop.permute.xlu1 %1554 }
0x1dad   :  { %2318 = vmatmul.mubr.msk.f32.vlgmr.msra.gmra.mxu0 %vm188_vm3, %v1555_v24 }
0x1dae   :  { %2332 = vmatpush3.msra.mxu0 %v2769_v37  ;;  %2339 = vmatprep.mubr.msk.f32.mxu0 %vm2491_vm2, %v2490_v0 }
0x1daf   :  { %2333 = vmatprep.subr.mxu0 %v2490_v0 }
0x1db0   :  { %2334 = vmatpush3.msra.mxu0 %v2775_v38 }
0x1db1   :  { %2335 = vmatprep.subr.mxu0 %v2490_v0 }
0x1db2   :  { %2336 = vmatpush3.msra.mxu0 %v2782_v39 }
0x1db3   :  { %2337 = vmatprep.subr.mxu0 %v2490_v0 }
0x1db4   :  { %2338 = vmatpush3.msra.mxu0 %v2789_v40 }
0x1e6d   :  { %v1624_v26 = vpop.f32.mrf.mxu0 }
0x1e6e   :  { %v1628_v27 = vadd.f32 %v1624_v26, %v1140_v25 }
0x1e6f   :  { %v2319_v28 = vpop.f32.mrf.mxu0 }
0x1e70   :  { %2454 = vtanh.f32 %v1628_v27  ;;  %v2032_v30 = vmul.f32 -1.442695, %v1628_v27 }
0x1e72   :  { %2456 = vpow2.f32 %v2032_v30 }
0x1e7d   :  { %v2455_v29 = vpop.eup %2454 }
0x1e7e   :  { %1638 = vrot.lane.b32.xlu0 %v2455_v29, %s2492_s23 }
0x1e7f   :  { %v2457_v31 = vpop.eup %2456 }
0x1e80   :  { %v1632_v32 = vadd.f32 1.0, %v2457_v31  ;;  %v14_v31 = vstv %s2963_s8 }
0x1e81   :  { %15 = vst [vmem:[#allocation3] sm:$0x1] %v14_v31 }
0x1e82   :  { %2458 = vrcp.f32 %v1632_v32 }
0x1e8f   :  { %v2459_v33 = vpop.eup %2458 }
0x1e90   :  { %v1636_v58 = vmul.f32 %v2459_v33, %v1546_v20 }
0x1ef0   :  { %v1639_v34 = vpop.permute.xlu0 %1638 }
0x1ef1   :  { %v1641_v35 = vmul.f32 %v2459_v33, %v1639_v34 }
0x1ef3   :  { %1643 = vrot.lane.b32.xlu1 %v1641_v35, %s2493_s3 }
0x1f65   :  { %v1644_v36 = vpop.permute.xlu1 %1643 }
0x1f66   :  { %v1646_v41 = vadd.f32 %v1644_v36, %v1636_v58 }
0x1f68   :  { %2460 = vtanh.f32 %v1646_v41 }
0x1f75   :  { %v2461_v42 = vpop.eup %2460 }
0x1f76   :  { %1649 = vrot.lane.b32.xlu0 %v2461_v42, %s2492_s23 }
0x1fe8   :  { %v1650_v43 = vpop.permute.xlu0 %1649 }
0x1fe9   :  { %v1652_v44 = vmul.f32 %v2459_v33, %v1650_v43 }
0x1feb   :  { %1654 = vrot.lane.b32.xlu1 %v1652_v44, %s2493_s3 }
0x205d   :  { %v1655_v45 = vpop.permute.xlu1 %1654 }
0x205e   :  { %2329 = vmatmul.mubr.msk.f32.vlgmr.msra.gmra.mxu1 %vm188_vm3, %v1655_v45 }
0x205f   :  { %2343 = vmatpush3.msra.mxu1 %v2769_v37  ;;  %2350 = vmatprep.mubr.msk.f32.mxu1 %vm2491_vm2, %v2490_v0 }
0x2060   :  { %2344 = vmatprep.subr.mxu1 %v2490_v0 }
0x2061   :  { %2345 = vmatpush3.msra.mxu1 %v2775_v38 }
0x2062   :  { %2346 = vmatprep.subr.mxu1 %v2490_v0 }
0x2063   :  { %2347 = vmatpush3.msra.mxu1 %v2782_v39 }
0x2064   :  { %2348 = vmatprep.subr.mxu1 %v2490_v0 }
0x2065   :  { %2349 = vmatpush3.msra.mxu1 %v2789_v40 }
0x211e   :  { %v1724_v50 = vpop.f32.mrf.mxu1 }
0x211f   :  { %v1728_v37 = vadd.f32 %v1724_v50, %v1145_v47 }
0x2120   :  { %v2330_v52 = vpop.f32.mrf.mxu1 }
0x2121   :  { %2462 = vtanh.f32 %v1728_v37  ;;  %v2034_v54 = vmul.f32 -1.442695, %v1728_v37 }
0x2123   :  { %2464 = vpow2.f32 %v2034_v54 }
0x212e   :  { %v2463_v53 = vpop.eup %2462 }
0x212f   :  { %1738 = vrot.lane.b32.xlu0 %v2463_v53, %s2492_s23 }
0x2130   :  { %v2465_v38 = vpop.eup %2464 }
0x2131   :  { %v1732_v2 = vadd.f32 1.0, %v2465_v38 }
0x2133   :  { %2466 = vrcp.f32 %v1732_v2 }
0x2140   :  { %v2467_v39 = vpop.eup %2466 }
0x2141   :  { %v1736_v40 = vmul.f32 %v2467_v39, %v1646_v41  ;;  %v2040_v41 = vld [vmem:[#allocation3] ss:$0 sm:$0xff] }
0x21a1   :  { %v1739_v56 = vpop.permute.xlu0 %1738 }
0x21a2   :  { %v1741_v0 = vmul.f32 %v2467_v39, %v1739_v56 }
0x21a4   :  { %1743 = vrot.lane.b32.xlu1 %v1741_v0, %s2493_s3 }
0x2216   :  { %v1744_v9 = vpop.permute.xlu1 %1743 }
0x2217   :  { %v1746_v46 = vadd.f32 %v1744_v9, %v1736_v40 }
0x2219   :  { %2468 = vtanh.f32 %v1746_v46 }
0x2226   :  { %v2469_v57 = vpop.eup %2468 }
0x2227   :  { %1749 = vrot.lane.b32.xlu0 %v2469_v57, %s2492_s23 }
0x2299   :  { %v1750_v59 = vpop.permute.xlu0 %1749 }
0x229a   :  { %v1752_v60 = vmul.f32 %v2467_v39, %v1750_v59 }
0x229c   :  { %1754 = vrot.lane.b32.xlu1 %v1752_v60, %s2493_s3 }
0x230e   :  { %v1755_v61 = vpop.permute.xlu1 %1754 }
0x230f   :  { %2340 = vmatmul.mubr.msk.f32.vlgmr.msra.gmra.mxu0 %vm188_vm3, %v1755_v61 }
0x23cf   :  { %v1824_v62 = vpop.f32.mrf.mxu0 }
0x23d0   :  { %v1828_v6 = vadd.f32 %v1824_v62, %v1150_v5 }
0x23d1   :  { %v2341_v63 = vpop.f32.mrf.mxu0 }
0x23d2   :  { %2470 = vtanh.f32 %v1828_v6  ;;  %v2036_v7 = vmul.f32 -1.442695, %v1828_v6 }
0x23d4   :  { %2472 = vpow2.f32 %v2036_v7 }
0x23df   :  { %v2471_v1 = vpop.eup %2470 }
0x23e0   :  { %1838 = vrot.lane.b32.xlu0 %v2471_v1, %s2492_s23 }
0x23e1   :  { %v2473_v3 = vpop.eup %2472 }
0x23e2   :  { %v1832_v4 = vadd.f32 1.0, %v2473_v3 }
0x23e4   :  { %2474 = vrcp.f32 %v1832_v4 }
0x23f1   :  { %v2475_v55 = vpop.eup %2474 }
0x23f2   :  { %v1836_v11 = vmul.f32 %v2475_v55, %v1746_v46 }
0x2452   :  { %v1839_v8 = vpop.permute.xlu0 %1838 }
0x2453   :  { %v1841_v10 = vmul.f32 %v2475_v55, %v1839_v8 }
0x2455   :  { %1843 = vrot.lane.b32.xlu1 %v1841_v10, %s2493_s3 }
0x24c7   :  { %v1844_v12 = vpop.permute.xlu1 %1843 }
0x24c8   :  { %v1846_v49 = vadd.f32 %v1844_v12, %v1836_v11 }
0x24ca   :  { %2476 = vtanh.f32 %v1846_v49 }
0x24d7   :  { %v2477_v13 = vpop.eup %2476 }
0x24d8   :  { %1849 = vrot.lane.b32.xlu0 %v2477_v13, %s2492_s23 }
0x254a   :  { %v1850_v14 = vpop.permute.xlu0 %1849 }
0x254b   :  { %v1852_v15 = vmul.f32 %v2475_v55, %v1850_v14 }
0x254d   :  { %1854 = vrot.lane.b32.xlu1 %v1852_v15, %s2493_s3 }
0x25bf   :  { %v1855_v16 = vpop.permute.xlu1 %1854 }
0x25c0   :  { %2351 = vmatmul.mubr.msk.f32.vlgmr.msra.gmra.mxu1 %vm188_vm3, %v1855_v16 }
0x2680   :  { %v1924_v18 = vpop.f32.mrf.mxu1 }
0x2681   :  { %v1928_v19 = vadd.f32 %v1924_v18, %v1155_v17 }
0x2682   :  { %v2352_v20 = vpop.f32.mrf.mxu1 }
0x2683   :  { %2478 = vtanh.f32 %v1928_v19  ;;  %v2038_v22 = vmul.f32 -1.442695, %v1928_v19 }
0x2685   :  { %2480 = vpow2.f32 %v2038_v22 }
0x2690   :  { %v2479_v21 = vpop.eup %2478 }
0x2691   :  { %1938 = vrot.lane.b32.xlu0 %v2479_v21, %s2492_s23 }
0x2692   :  { %v2481_v23 = vpop.eup %2480 }
0x2693   :  { %v1932_v24 = vadd.f32 1.0, %v2481_v23 }
0x2695   :  { %2482 = vrcp.f32 %v1932_v24 }
0x26a2   :  { %v2483_v25 = vpop.eup %2482 }
0x26a3   :  { %v1936_v48 = vmul.f32 %v2483_v25, %v1846_v49 }
0x2703   :  { %v1939_v26 = vpop.permute.xlu0 %1938 }
0x2704   :  { %v1941_v27 = vmul.f32 %v2483_v25, %v1939_v26 }
0x2706   :  { %1943 = vrot.lane.b32.xlu1 %v1941_v27, %s2493_s3 }
0x270a   :  { %1959 = vrot.lane.b32.xlu1 %v2039_v51, %s2494_s30 }
0x2778   :  { %v1944_v28 = vpop.permute.xlu1 %1943 }
0x2779   :  { %v1946_v29 = vadd.f32 %v1944_v28, %v1936_v48 }
0x277b   :  { %2484 = vtanh.f32 %v1946_v29 }
0x277c   :  { %v1960_v33 = vpop.permute.xlu1 %1959 }
0x2788   :  { %v2485_v30 = vpop.eup %2484 }
0x2789   :  { %1949 = vrot.lane.b32.xlu0 %v2485_v30, %s2492_s23 }
0x27fb   :  { %v1950_v32 = vpop.permute.xlu0 %1949 }
0x27fc   :  { %v1952_v34 = vmul.f32 %v2483_v25, %v1950_v32 }
0x27fe   :  { %v1962_v35 = vmul.f32 %v1960_v33, %v1952_v34 }
0x2800   :  { %1964 = vrot.lane.b32.xlu0 %v1962_v35, %s2493_s3 }
0x2872   :  { %v1965_v58 = vpop.permute.xlu0 %1964 }
0x2873   :  { %v1967_v36 = vsel %vm188_vm3, %v1965_v58, 0.0 }
0x2874   :  { %1968 = vadd.xlane.f32.xlu1 %v1967_v36 }
0x28fd   :  { %v1969_v42 = vpop.xlane.xlu1 %1968 }
0x28fe   :  { %v1977_v43 = vadd.f32 %v2040_v41, %v1969_v42 }
0x2900   :  { %v2041_v44 = vmul.f32 -1.442695, %v1977_v43 }
0x2902   :  { %2486 = vpow2.f32 %v2041_v44 }
0x290f   :  { %v2487_v45 = vpop.eup %2486 }
0x2910   :  { %v1981_v47 = vadd.f32 1.0, %v2487_v45 }
0x2912   :  { %2488 = vrcp.f32 %v1981_v47 }
0x291f   :  { %v2489_v50 = vpop.eup %2488 }
0x2920   :  { %1985 = vst.msk [vmem:[%s2964_s9] sm:$0xff] %vm1984_vm4, %v2489_v50 }

</bundles_post_ra>
